<compile_context>
chip_gen: v7x
topology: tpu7x:2x2x1
jax: 0.10.0
libtpu: 0.0.40
codegen_flags: <defaults>
</compile_context>

<pallas_src>
import functools

import jax
import jax.numpy as jnp
import numpy as np
from jax import lax
from jax.experimental import pallas as pl
from jax.experimental.pallas import tpu as pltpu


def _round_up(v, m):
    return (v + m - 1) // m * m


def _erf_f32(z):
    # Abramowitz & Stegun 7.1.26, |error| < 1.5e-7.  Only where/mul/add/div/exp.
    sgn = jnp.where(z >= 0.0, 1.0, -1.0)
    a = jnp.where(z >= 0.0, z, -z)
    t = 1.0 / (1.0 + 0.3275911 * a)
    poly = t * (0.254829592 + t * (-0.284496736 + t * (1.421413741
                + t * (-1.453152027 + t * 1.061405429))))
    return sgn * (1.0 - poly * jnp.exp(-a * a))


def _gelu_exact(x):
    return 0.5 * x * (1.0 + _erf_f32(x * 0.7071067811865476))


# ------------------------------ fused kernel ---------------------------------

def _block_kernel(x_ref, g1_ref, b1_ref, wqkv_ref, wp_ref, bp_ref,
                  g2_ref, b2_ref, w1_ref, bb1_ref, w2_ref, bb2_ref,
                  out_ref, *, c_real, n_real, num_heads, scale, approx_softmax):
    n_pad, c_pad = x_ref.shape[1], x_ref.shape[2]
    hd = c_real // num_heads
    mm_dtype = wqkv_ref.dtype                       # bf16 MXU operands

    # Channel-validity mask: LayerNorm stats over the real C channels only
    # (padded channels of every activation are kept exactly zero).
    ch_mask = lax.broadcasted_iota(jnp.int32, (1, c_pad), 1) < c_real
    inv_c = 1.0 / c_real

    def layernorm(v, g, b):
        mean = jnp.sum(v, axis=-1, keepdims=True) * inv_c
        cen = jnp.where(ch_mask, v - mean, 0.0)
        var = jnp.sum(cen * cen, axis=-1, keepdims=True) * inv_c
        return cen * lax.rsqrt(var + 1e-5) * g + b   # pads stay 0

    x = x_ref[0]                                     # (Np, Cp) f32

    # ---- attention branch ----------------------------------------------------
    xn = layernorm(x, g1_ref[...], b1_ref[...])
    # One full-width matmul for Q, K and V (q cols [0:Cp), k [Cp:2Cp), v [2Cp:3Cp)).
    qkv = jnp.dot(xn.astype(mm_dtype), wqkv_ref[...],
                  preferred_element_type=jnp.float32)          # (Np, 3Cp) f32

    # Mixed attention mask: cls query (row 0) attends to all real tokens;
    # feature queries (rows >= 1) attend to features only (not the cls key);
    # padded key columns (col >= N) are masked everywhere.
    row = lax.broadcasted_iota(jnp.int32, (n_pad, n_pad), 0)
    col = lax.broadcasted_iota(jnp.int32, (n_pad, n_pad), 1)
    attn_ok = jnp.logical_and(col < n_real,
                              jnp.logical_or(row == 0, col >= 1))

    heads = []
    for h in range(num_heads):                       # static, small H
        lo = h * hd
        qh = qkv[:, lo:lo + hd].astype(mm_dtype)
        kh = qkv[:, c_pad + lo:c_pad + lo + hd].astype(mm_dtype)
        vh = qkv[:, 2 * c_pad + lo:2 * c_pad + lo + hd].astype(mm_dtype)

        s = jnp.einsum('nd,md->nm', qh, kh,
                       preferred_element_type=jnp.float32) * scale
        s = jnp.where(attn_ok, s, -1e30)             # f32 scores -> safe constant
        s = s - jnp.max(s, axis=-1, keepdims=True)
        e = jnp.exp(s)
        denom = jnp.sum(e, axis=-1, keepdims=True)
        if approx_softmax:
            p = e * pl.reciprocal(denom, approx=True)
        else:
            p = e / denom
        heads.append(jnp.einsum('nm,md->nd', p.astype(mm_dtype), vh,
                                preferred_element_type=jnp.float32))
    o = jnp.concatenate(heads, axis=-1)              # (Np, C), head-major cols

    proj = jnp.dot(o.astype(mm_dtype), wp_ref[...],
                   preferred_element_type=jnp.float32) + bp_ref[...]
    x1 = x + proj                                    # residual 1 (f32)

    # ---- MLP branch ------------------------------------------------------------
    xn2 = layernorm(x1, g2_ref[...], b2_ref[...])
    hmid = jnp.dot(xn2.astype(mm_dtype), w1_ref[...],
                   preferred_element_type=jnp.float32) + bb1_ref[...]
    hmid = _gelu_exact(hmid)                         # exact-erf GELU, f32
    y = jnp.dot(hmid.astype(mm_dtype), w2_ref[...],
                preferred_element_type=jnp.float32) + bb2_ref[...]
    out_ref[0] = (x1 + y).astype(out_ref.dtype)      # residual 2


# --------------------------------- wrapper ------------------------------------

def block_mixattn_feature_clstoken(x, params, *, hw, num_heads,
                                   mm_dtype=jnp.bfloat16, approx_softmax=True):
    B, N, C = x.shape
    assert N == 1 + hw
    assert C % num_heads == 0
    hd = C // num_heads
    scale = hd ** -0.5
    MH = params["w1"].shape[1]

    LANE, SUB = 128, 8
    Cp = _round_up(C, LANE)
    MHp = _round_up(MH, LANE)
    Np = _round_up(N, SUB)
    pc, pm, pn = Cp - C, MHp - MH, Np - N

    # Pad the activation only when needed (skip the extra HBM pass otherwise).
    x_p = jnp.pad(x, ((0, 0), (0, pn), (0, pc))) if (pc or pn) else x

    def padw(w, pr, pcc):
        return jnp.pad(w, ((0, pr), (0, pcc))) if (pr or pcc) else w

    def padv(v, p):
        return jnp.pad(v, ((0, 0), (0, p))) if p else v

    # Fused QKV weight, lane-aligned per section: (Cp, 3*Cp), zero-padded.
    wqkv = params["w_qkv"]                              # (C, 3C), x @ W layout
    wqkv_p = jnp.concatenate(
        [padw(wqkv[:, :C], pc, pc),
         padw(wqkv[:, C:2 * C], pc, pc),
         padw(wqkv[:, 2 * C:], pc, pc)], axis=1).astype(mm_dtype)
    wp_p = padw(params["w_proj"], 0, pc).astype(mm_dtype)    # (C, Cp)
    w1_p = padw(params["w1"], pc, pm).astype(mm_dtype)       # (Cp, MHp)
    w2_p = padw(params["w2"], pm, pc).astype(mm_dtype)       # (MHp, Cp)

    g1 = padv(params["ln1_g"], pc); b1 = padv(params["ln1_b"], pc)
    g2 = padv(params["ln2_g"], pc); b2 = padv(params["ln2_b"], pc)
    bp = padv(params["b_proj"], pc)
    bb1 = padv(params["b1"], pm)
    bb2 = padv(params["b2"], pc)

    consts = [g1, b1, wqkv_p, wp_p, bp, g2, b2, w1_p, bb1, w2_p, bb2]

    tok_spec = pl.BlockSpec((1, Np, Cp), lambda b: (b, 0, 0))

    def full_spec(a):
        nd = a.ndim
        return pl.BlockSpec(a.shape, lambda b, _nd=nd: (0,) * _nd)

    kernel = functools.partial(_block_kernel, c_real=C, n_real=N,
                               num_heads=num_heads, scale=scale,
                               approx_softmax=approx_softmax)

    # Advisory cost estimate for the XLA scheduler.
    flops = (2 * B * Np * Cp * (3 * Cp)                 # fused qkv
             + 2 * B * num_heads * Np * Np * hd * 2     # qk^T + p@v
             + 2 * B * Np * C * Cp                      # proj
             + 2 * B * Np * Cp * MHp + 2 * B * Np * MHp * Cp)  # mlp
    transcend = B * (num_heads * Np * Np + Np * MHp)
    weight_bytes = sum(int(a.size) * a.dtype.itemsize for a in consts)
    bytes_accessed = 2 * B * Np * Cp * x.dtype.itemsize + weight_bytes
    cost = pl.CostEstimate(flops=int(flops), transcendentals=int(transcend),
                           bytes_accessed=int(bytes_accessed))

    # VMEM budget: resident weights (x2 buffering) + a few token slabs,
    # clamped to stay inside every generation's physical VMEM.
    vmem_limit = int(min(64 * 1024 * 1024,
                         max(32 * 1024 * 1024,
                             2 * weight_bytes + 8 * Np * Cp * 4)))

    fn = pl.pallas_call(
        kernel,
        out_shape=jax.ShapeDtypeStruct((B, Np, Cp), x.dtype),
        grid_spec=pltpu.PrefetchScalarGridSpec(
            num_scalar_prefetch=0,
            grid=(B,),
            in_specs=[tok_spec] + [full_spec(a) for a in consts],
            out_specs=tok_spec),
        compiler_params=pltpu.CompilerParams(
            dimension_semantics=("parallel",),
            vmem_limit_bytes=vmem_limit),
        cost_estimate=cost,
        # Alias only when x_p is a fresh padded temp (never donate caller's x).
        input_output_aliases={0: 0} if (pc or pn) else {},
    )
    out_p = fn(x_p, *consts)
    return out_p[:, :N, :C] if (pc or pn) else out_p


# --------------------------- pure-JAX reference -------------------------------

def _reference(x, params, *, hw, num_heads):
    B, N, C = x.shape
    hd = C // num_heads
    scale = hd ** -0.5

    def ln(v, g, b):
        m = jnp.mean(v, axis=-1, keepdims=True)
        var = jnp.mean((v - m) ** 2, axis=-1, keepdims=True)
        return (v - m) / jnp.sqrt(var + 1e-5) * g + b

    xn = ln(x, params["ln1_g"], params["ln1_b"])
    qkv = xn @ params["w_qkv"]                                    # (B, N, 3C)
    qkv = qkv.reshape(B, N, 3, num_heads, hd).transpose(2, 0, 3, 1, 4)
    q, k, v = qkv[0], qkv[1], qkv[2]                              # (B, H, N, hd)

    cls_q, feat_q = q[:, :, :1], q[:, :, 1:]
    feat_k, feat_v = k[:, :, 1:], v[:, :, 1:]

    fa = jax.nn.softmax(jnp.einsum("bhnd,bhmd->bhnm", feat_q, feat_k) * scale, -1)
    feat = jnp.einsum("bhnm,bhmd->bhnd", fa, feat_v)
    feat = feat.transpose(0, 2, 1, 3).reshape(B, hw, C)

    ca = jax.nn.softmax(jnp.einsum("bhnd,bhmd->bhnm", cls_q, k) * scale, -1)
    cls = jnp.einsum("bhnm,bhmd->bhnd", ca, v)
    cls = cls.transpose(0, 2, 1, 3).reshape(B, 1, C)

    attn_out = jnp.concatenate([cls, feat], axis=1) @ params["w_proj"] + params["b_proj"]
    x = x + attn_out

    xn2 = ln(x, params["ln2_g"], params["ln2_b"])
    h = jax.nn.gelu(xn2 @ params["w1"] + params["b1"], approximate=False)
    return x + (h @ params["w2"] + params["b2"])


# ------------------------------------ main ------------------------------------

if __name__ == "__main__":
    B, hw, C, num_heads = 2, 16, 32, 4
    N = 1 + hw
    MH = int(C * 4.0)

    key = jax.random.PRNGKey(0)
    ks = jax.random.split(key, 8)
    f32 = jnp.float32
    params = {
        "ln1_g": jnp.ones((1, C), f32),
        "ln1_b": jnp.zeros((1, C), f32),
        "w_qkv": (0.02 * jax.random.normal(ks[0], (C, 3 * C))).astype(f32),
        "w_proj": (0.02 * jax.random.normal(ks[1], (C, C))).astype(f32),
        "b_proj": (0.02 * jax.random.normal(ks[2], (1, C))).astype(f32),
        "ln2_g": jnp.ones((1, C), f32),
        "ln2_b": jnp.zeros((1, C), f32),
        "w1": (0.02 * jax.random.normal(ks[3], (C, MH))).astype(f32),
        "b1": (0.02 * jax.random.normal(ks[4], (1, MH))).astype(f32),
        "w2": (0.02 * jax.random.normal(ks[5], (MH, C))).astype(f32),
        "b2": (0.02 * jax.random.normal(ks[6], (1, C))).astype(f32),
    }
    x = jax.random.normal(ks[7], (B, N, C), dtype=f32)

    fwd = jax.jit(functools.partial(block_mixattn_feature_clstoken,
                                    hw=hw, num_heads=num_heads))
    out = jax.block_until_ready(fwd(x, params))

    ref = jax.block_until_ready(_reference(x, params, hw=hw, num_heads=num_heads))
    # bf16 MXU operands + approx softmax reciprocal vs exact-f32 reference
    # -> relaxed tolerance (estimated error ~3e-3, margin ~7x).
    np.testing.assert_allclose(np.asarray(out), np.asarray(ref),
                               rtol=2e-2, atol=2e-2)
    print("KERNEL_OK")
</pallas_src>

<mosaic_0001>
module attributes {stable_mosaic.version = 11 : i64} {
  func.func @_block_kernel(%arg0: i32, %arg1: memref<1x24x128xf32, #tpu.memory_space<vmem>>, %arg2: memref<1x128xf32, #tpu.memory_space<vmem>>, %arg3: memref<1x128xf32, #tpu.memory_space<vmem>>, %arg4: memref<128x384xbf16, #tpu.memory_space<vmem>>, %arg5: memref<32x128xbf16, #tpu.memory_space<vmem>>, %arg6: memref<1x128xf32, #tpu.memory_space<vmem>>, %arg7: memref<1x128xf32, #tpu.memory_space<vmem>>, %arg8: memref<1x128xf32, #tpu.memory_space<vmem>>, %arg9: memref<128x128xbf16, #tpu.memory_space<vmem>>, %arg10: memref<1x128xf32, #tpu.memory_space<vmem>>, %arg11: memref<128x128xbf16, #tpu.memory_space<vmem>>, %arg12: memref<1x128xf32, #tpu.memory_space<vmem>>, %arg13: memref<1x24x128xf32, #tpu.memory_space<vmem>>) attributes {dimension_semantics = [#tpu.dimension_semantics<parallel>], iteration_bounds = array<i64: 2>, scalar_prefetch = 0 : i64, scratch_operands = 0 : i64, tpu.core_type = #tpu.core_type<tc>, window_params = [{transform_indices = @transform_0, window_bounds = array<i64: 1, 24, 128>}, {pipeline_mode = #tpu.pipeline_mode<synchronous>, transform_indices = @transform_1, window_bounds = array<i64: 1, 128>}, {pipeline_mode = #tpu.pipeline_mode<synchronous>, transform_indices = @transform_2, window_bounds = array<i64: 1, 128>}, {pipeline_mode = #tpu.pipeline_mode<synchronous>, transform_indices = @transform_3, window_bounds = array<i64: 128, 384>}, {pipeline_mode = #tpu.pipeline_mode<synchronous>, transform_indices = @transform_4, window_bounds = array<i64: 32, 128>}, {pipeline_mode = #tpu.pipeline_mode<synchronous>, transform_indices = @transform_5, window_bounds = array<i64: 1, 128>}, {pipeline_mode = #tpu.pipeline_mode<synchronous>, transform_indices = @transform_6, window_bounds = array<i64: 1, 128>}, {pipeline_mode = #tpu.pipeline_mode<synchronous>, transform_indices = @transform_7, window_bounds = array<i64: 1, 128>}, {pipeline_mode = #tpu.pipeline_mode<synchronous>, transform_indices = @transform_8, window_bounds = array<i64: 128, 128>}, {pipeline_mode = #tpu.pipeline_mode<synchronous>, transform_indices = @transform_9, window_bounds = array<i64: 1, 128>}, {pipeline_mode = #tpu.pipeline_mode<synchronous>, transform_indices = @transform_10, window_bounds = array<i64: 128, 128>}, {pipeline_mode = #tpu.pipeline_mode<synchronous>, transform_indices = @transform_11, window_bounds = array<i64: 1, 128>}, {transform_indices = @transform_12, window_bounds = array<i64: 1, 24, 128>}]} {
    %0 = tpu.iota {dimensions = array<i32: 1>} : vector<1x128xi32>
    %c32_i32 = arith.constant 32 : i32
    %1 = vector.broadcast %c32_i32 : i32 to vector<1x128xi32>
    %2 = arith.cmpi slt, %0, %1 : vector<1x128xi32>
    %c0 = arith.constant 0 : index
    %c0_0 = arith.constant 0 : index
    %c0_1 = arith.constant 0 : index
    %3 = vector.load %arg1[%c0, %c0_0, %c0_1] : memref<1x24x128xf32, #tpu.memory_space<vmem>>, vector<1x24x128xf32>
    %4 = vector.shape_cast %3 : vector<1x24x128xf32> to vector<24x128xf32>
    %c0_2 = arith.constant 0 : index
    %c0_3 = arith.constant 0 : index
    %5 = vector.load %arg2[%c0_2, %c0_3] : memref<1x128xf32, #tpu.memory_space<vmem>>, vector<1x128xf32>
    %c0_4 = arith.constant 0 : index
    %c0_5 = arith.constant 0 : index
    %6 = vector.load %arg3[%c0_4, %c0_5] : memref<1x128xf32, #tpu.memory_space<vmem>>, vector<1x128xf32>
    %cst = arith.constant dense<0.000000e+00> : vector<24xf32>
    %7 = vector.multi_reduction <add>, %4, %cst [1] : vector<24x128xf32> to vector<24xf32>
    %8 = vector.shape_cast %7 : vector<24xf32> to vector<24x1xf32>
    %cst_6 = arith.constant 3.125000e-02 : f32
    %9 = vector.broadcast %cst_6 : f32 to vector<24x1xf32>
    %10 = arith.mulf %8, %9 : vector<24x1xf32>
    %11 = vector.broadcast %10 : vector<24x1xf32> to vector<24x128xf32>
    %12 = arith.subf %4, %11 : vector<24x128xf32>
    %cst_7 = arith.constant 0.000000e+00 : f32
    %13 = vector.shape_cast %2 : vector<1x128xi1> to vector<1x128xi1>
    %14 = vector.broadcast %13 : vector<1x128xi1> to vector<24x128xi1>
    %15 = vector.broadcast %cst_7 : f32 to vector<24x128xf32>
    %16 = arith.select %14, %12, %15 : vector<24x128xi1>, vector<24x128xf32>
    %17 = arith.mulf %16, %16 : vector<24x128xf32>
    %cst_8 = arith.constant dense<0.000000e+00> : vector<24xf32>
    %18 = vector.multi_reduction <add>, %17, %cst_8 [1] : vector<24x128xf32> to vector<24xf32>
    %19 = vector.shape_cast %18 : vector<24xf32> to vector<24x1xf32>
    %cst_9 = arith.constant 3.125000e-02 : f32
    %20 = vector.broadcast %cst_9 : f32 to vector<24x1xf32>
    %21 = arith.mulf %19, %20 : vector<24x1xf32>
    %cst_10 = arith.constant 9.99999974E-6 : f32
    %22 = vector.broadcast %cst_10 : f32 to vector<24x1xf32>
    %23 = arith.addf %21, %22 : vector<24x1xf32>
    %24 = math.rsqrt %23 : vector<24x1xf32>
    %25 = vector.broadcast %24 : vector<24x1xf32> to vector<24x128xf32>
    %26 = arith.mulf %16, %25 : vector<24x128xf32>
    %27 = vector.broadcast %5 : vector<1x128xf32> to vector<24x128xf32>
    %28 = arith.mulf %26, %27 : vector<24x128xf32>
    %29 = vector.broadcast %6 : vector<1x128xf32> to vector<24x128xf32>
    %30 = arith.addf %28, %29 : vector<24x128xf32>
    %31 = arith.truncf %30 : vector<24x128xf32> to vector<24x128xbf16>
    %c0_11 = arith.constant 0 : index
    %c0_12 = arith.constant 0 : index
    %32 = vector.load %arg4[%c0_11, %c0_12] : memref<128x384xbf16, #tpu.memory_space<vmem>>, vector<128x384xbf16>
    %cst_13 = arith.constant dense<0.000000e+00> : vector<24x384xf32>
    %33 = tpu.matmul %31, %32, %cst_13 {dimension_numbers = #tpu.dot_dimension_numbers<[1], [0], [0], [1], [0, 0, 1, 1], [], []>} : vector<24x128xbf16>, vector<128x384xbf16>, vector<24x384xf32> -> vector<24x384xf32>
    %34 = tpu.iota {dimensions = array<i32: 0>} : vector<24x24xi32>
    %35 = tpu.iota {dimensions = array<i32: 1>} : vector<24x24xi32>
    %c17_i32 = arith.constant 17 : i32
    %36 = vector.broadcast %c17_i32 : i32 to vector<24x24xi32>
    %37 = arith.cmpi slt, %35, %36 : vector<24x24xi32>
    %c0_i32 = arith.constant 0 : i32
    %38 = vector.broadcast %c0_i32 : i32 to vector<24x24xi32>
    %39 = arith.cmpi eq, %34, %38 : vector<24x24xi32>
    %c1_i32 = arith.constant 1 : i32
    %40 = vector.broadcast %c1_i32 : i32 to vector<24x24xi32>
    %41 = arith.cmpi sge, %35, %40 : vector<24x24xi32>
    %42 = arith.ori %39, %41 : vector<24x24xi1>
    %43 = arith.andi %37, %42 : vector<24x24xi1>
    %44 = vector.extract_strided_slice %33 {offsets = [0, 0], sizes = [24, 8], strides = [1, 1]} : vector<24x384xf32> to vector<24x8xf32>
    %45 = arith.truncf %44 : vector<24x8xf32> to vector<24x8xbf16>
    %46 = vector.extract_strided_slice %33 {offsets = [0, 128], sizes = [24, 8], strides = [1, 1]} : vector<24x384xf32> to vector<24x8xf32>
    %47 = arith.truncf %46 : vector<24x8xf32> to vector<24x8xbf16>
    %48 = vector.extract_strided_slice %33 {offsets = [0, 256], sizes = [24, 8], strides = [1, 1]} : vector<24x384xf32> to vector<24x8xf32>
    %49 = arith.truncf %48 : vector<24x8xf32> to vector<24x8xbf16>
    "tpu.trace_start"() <{level = 10 : i32, message = "nd,md->nm"}> : () -> ()
    %cst_14 = arith.constant dense<0.000000e+00> : vector<24x24xf32>
    %50 = tpu.matmul %45, %47, %cst_14 {dimension_numbers = #tpu.dot_dimension_numbers<[1], [1], [0], [0], [0, 0, 1, 0], [], []>} : vector<24x8xbf16>, vector<24x8xbf16>, vector<24x24xf32> -> vector<24x24xf32>
    "tpu.trace_stop"() : () -> ()
    %cst_15 = arith.constant 0.353553385 : f32
    %51 = vector.broadcast %cst_15 : f32 to vector<24x24xf32>
    %52 = arith.mulf %50, %51 : vector<24x24xf32>
    %cst_16 = arith.constant -1.000000e+30 : f32
    %53 = vector.broadcast %cst_16 : f32 to vector<24x24xf32>
    %54 = arith.select %43, %52, %53 : vector<24x24xi1>, vector<24x24xf32>
    %cst_17 = arith.constant dense<0xFF800000> : vector<24xf32>
    %55 = vector.multi_reduction <maximumf>, %54, %cst_17 [1] : vector<24x24xf32> to vector<24xf32>
    %56 = vector.shape_cast %55 : vector<24xf32> to vector<24x1xf32>
    %57 = vector.broadcast %56 : vector<24x1xf32> to vector<24x24xf32>
    %58 = arith.subf %54, %57 : vector<24x24xf32>
    %59 = math.exp %58 : vector<24x24xf32>
    %cst_18 = arith.constant dense<0.000000e+00> : vector<24xf32>
    %60 = vector.multi_reduction <add>, %59, %cst_18 [1] : vector<24x24xf32> to vector<24xf32>
    %61 = vector.shape_cast %60 : vector<24xf32> to vector<24x1xf32>
    %62 = tpu.reciprocal %61 {approx = true} : vector<24x1xf32> -> vector<24x1xf32>
    %63 = vector.broadcast %62 : vector<24x1xf32> to vector<24x24xf32>
    %64 = arith.mulf %59, %63 : vector<24x24xf32>
    %65 = arith.truncf %64 : vector<24x24xf32> to vector<24x24xbf16>
    "tpu.trace_start"() <{level = 10 : i32, message = "nm,md->nd"}> : () -> ()
    %cst_19 = arith.constant dense<0.000000e+00> : vector<24x8xf32>
    %66 = tpu.matmul %65, %49, %cst_19 {dimension_numbers = #tpu.dot_dimension_numbers<[1], [0], [0], [1], [0, 0, 1, 1], [], []>} : vector<24x24xbf16>, vector<24x8xbf16>, vector<24x8xf32> -> vector<24x8xf32>
    "tpu.trace_stop"() : () -> ()
    %67 = vector.extract_strided_slice %33 {offsets = [0, 8], sizes = [24, 8], strides = [1, 1]} : vector<24x384xf32> to vector<24x8xf32>
    %68 = arith.truncf %67 : vector<24x8xf32> to vector<24x8xbf16>
    %69 = vector.extract_strided_slice %33 {offsets = [0, 136], sizes = [24, 8], strides = [1, 1]} : vector<24x384xf32> to vector<24x8xf32>
    %70 = arith.truncf %69 : vector<24x8xf32> to vector<24x8xbf16>
    %71 = vector.extract_strided_slice %33 {offsets = [0, 264], sizes = [24, 8], strides = [1, 1]} : vector<24x384xf32> to vector<24x8xf32>
    %72 = arith.truncf %71 : vector<24x8xf32> to vector<24x8xbf16>
    "tpu.trace_start"() <{level = 10 : i32, message = "nd,md->nm"}> : () -> ()
    %cst_20 = arith.constant dense<0.000000e+00> : vector<24x24xf32>
    %73 = tpu.matmul %68, %70, %cst_20 {dimension_numbers = #tpu.dot_dimension_numbers<[1], [1], [0], [0], [0, 0, 1, 0], [], []>} : vector<24x8xbf16>, vector<24x8xbf16>, vector<24x24xf32> -> vector<24x24xf32>
    "tpu.trace_stop"() : () -> ()
    %cst_21 = arith.constant 0.353553385 : f32
    %74 = vector.broadcast %cst_21 : f32 to vector<24x24xf32>
    %75 = arith.mulf %73, %74 : vector<24x24xf32>
    %cst_22 = arith.constant -1.000000e+30 : f32
    %76 = vector.broadcast %cst_22 : f32 to vector<24x24xf32>
    %77 = arith.select %43, %75, %76 : vector<24x24xi1>, vector<24x24xf32>
    %cst_23 = arith.constant dense<0xFF800000> : vector<24xf32>
    %78 = vector.multi_reduction <maximumf>, %77, %cst_23 [1] : vector<24x24xf32> to vector<24xf32>
    %79 = vector.shape_cast %78 : vector<24xf32> to vector<24x1xf32>
    %80 = vector.broadcast %79 : vector<24x1xf32> to vector<24x24xf32>
    %81 = arith.subf %77, %80 : vector<24x24xf32>
    %82 = math.exp %81 : vector<24x24xf32>
    %cst_24 = arith.constant dense<0.000000e+00> : vector<24xf32>
    %83 = vector.multi_reduction <add>, %82, %cst_24 [1] : vector<24x24xf32> to vector<24xf32>
    %84 = vector.shape_cast %83 : vector<24xf32> to vector<24x1xf32>
    %85 = tpu.reciprocal %84 {approx = true} : vector<24x1xf32> -> vector<24x1xf32>
    %86 = vector.broadcast %85 : vector<24x1xf32> to vector<24x24xf32>
    %87 = arith.mulf %82, %86 : vector<24x24xf32>
    %88 = arith.truncf %87 : vector<24x24xf32> to vector<24x24xbf16>
    "tpu.trace_start"() <{level = 10 : i32, message = "nm,md->nd"}> : () -> ()
    %cst_25 = arith.constant dense<0.000000e+00> : vector<24x8xf32>
    %89 = tpu.matmul %88, %72, %cst_25 {dimension_numbers = #tpu.dot_dimension_numbers<[1], [0], [0], [1], [0, 0, 1, 1], [], []>} : vector<24x24xbf16>, vector<24x8xbf16>, vector<24x8xf32> -> vector<24x8xf32>
    "tpu.trace_stop"() : () -> ()
    %90 = vector.extract_strided_slice %33 {offsets = [0, 16], sizes = [24, 8], strides = [1, 1]} : vector<24x384xf32> to vector<24x8xf32>
    %91 = arith.truncf %90 : vector<24x8xf32> to vector<24x8xbf16>
    %92 = vector.extract_strided_slice %33 {offsets = [0, 144], sizes = [24, 8], strides = [1, 1]} : vector<24x384xf32> to vector<24x8xf32>
    %93 = arith.truncf %92 : vector<24x8xf32> to vector<24x8xbf16>
    %94 = vector.extract_strided_slice %33 {offsets = [0, 272], sizes = [24, 8], strides = [1, 1]} : vector<24x384xf32> to vector<24x8xf32>
    %95 = arith.truncf %94 : vector<24x8xf32> to vector<24x8xbf16>
    "tpu.trace_start"() <{level = 10 : i32, message = "nd,md->nm"}> : () -> ()
    %cst_26 = arith.constant dense<0.000000e+00> : vector<24x24xf32>
    %96 = tpu.matmul %91, %93, %cst_26 {dimension_numbers = #tpu.dot_dimension_numbers<[1], [1], [0], [0], [0, 0, 1, 0], [], []>} : vector<24x8xbf16>, vector<24x8xbf16>, vector<24x24xf32> -> vector<24x24xf32>
    "tpu.trace_stop"() : () -> ()
    %cst_27 = arith.constant 0.353553385 : f32
    %97 = vector.broadcast %cst_27 : f32 to vector<24x24xf32>
    %98 = arith.mulf %96, %97 : vector<24x24xf32>
    %cst_28 = arith.constant -1.000000e+30 : f32
    %99 = vector.broadcast %cst_28 : f32 to vector<24x24xf32>
    %100 = arith.select %43, %98, %99 : vector<24x24xi1>, vector<24x24xf32>
    %cst_29 = arith.constant dense<0xFF800000> : vector<24xf32>
    %101 = vector.multi_reduction <maximumf>, %100, %cst_29 [1] : vector<24x24xf32> to vector<24xf32>
    %102 = vector.shape_cast %101 : vector<24xf32> to vector<24x1xf32>
    %103 = vector.broadcast %102 : vector<24x1xf32> to vector<24x24xf32>
    %104 = arith.subf %100, %103 : vector<24x24xf32>
    %105 = math.exp %104 : vector<24x24xf32>
    %cst_30 = arith.constant dense<0.000000e+00> : vector<24xf32>
    %106 = vector.multi_reduction <add>, %105, %cst_30 [1] : vector<24x24xf32> to vector<24xf32>
    %107 = vector.shape_cast %106 : vector<24xf32> to vector<24x1xf32>
    %108 = tpu.reciprocal %107 {approx = true} : vector<24x1xf32> -> vector<24x1xf32>
    %109 = vector.broadcast %108 : vector<24x1xf32> to vector<24x24xf32>
    %110 = arith.mulf %105, %109 : vector<24x24xf32>
    %111 = arith.truncf %110 : vector<24x24xf32> to vector<24x24xbf16>
    "tpu.trace_start"() <{level = 10 : i32, message = "nm,md->nd"}> : () -> ()
    %cst_31 = arith.constant dense<0.000000e+00> : vector<24x8xf32>
    %112 = tpu.matmul %111, %95, %cst_31 {dimension_numbers = #tpu.dot_dimension_numbers<[1], [0], [0], [1], [0, 0, 1, 1], [], []>} : vector<24x24xbf16>, vector<24x8xbf16>, vector<24x8xf32> -> vector<24x8xf32>
    "tpu.trace_stop"() : () -> ()
    %113 = vector.extract_strided_slice %33 {offsets = [0, 24], sizes = [24, 8], strides = [1, 1]} : vector<24x384xf32> to vector<24x8xf32>
    %114 = arith.truncf %113 : vector<24x8xf32> to vector<24x8xbf16>
    %115 = vector.extract_strided_slice %33 {offsets = [0, 152], sizes = [24, 8], strides = [1, 1]} : vector<24x384xf32> to vector<24x8xf32>
    %116 = arith.truncf %115 : vector<24x8xf32> to vector<24x8xbf16>
    %117 = vector.extract_strided_slice %33 {offsets = [0, 280], sizes = [24, 8], strides = [1, 1]} : vector<24x384xf32> to vector<24x8xf32>
    %118 = arith.truncf %117 : vector<24x8xf32> to vector<24x8xbf16>
    "tpu.trace_start"() <{level = 10 : i32, message = "nd,md->nm"}> : () -> ()
    %cst_32 = arith.constant dense<0.000000e+00> : vector<24x24xf32>
    %119 = tpu.matmul %114, %116, %cst_32 {dimension_numbers = #tpu.dot_dimension_numbers<[1], [1], [0], [0], [0, 0, 1, 0], [], []>} : vector<24x8xbf16>, vector<24x8xbf16>, vector<24x24xf32> -> vector<24x24xf32>
    "tpu.trace_stop"() : () -> ()
    %cst_33 = arith.constant 0.353553385 : f32
    %120 = vector.broadcast %cst_33 : f32 to vector<24x24xf32>
    %121 = arith.mulf %119, %120 : vector<24x24xf32>
    %cst_34 = arith.constant -1.000000e+30 : f32
    %122 = vector.broadcast %cst_34 : f32 to vector<24x24xf32>
    %123 = arith.select %43, %121, %122 : vector<24x24xi1>, vector<24x24xf32>
    %cst_35 = arith.constant dense<0xFF800000> : vector<24xf32>
    %124 = vector.multi_reduction <maximumf>, %123, %cst_35 [1] : vector<24x24xf32> to vector<24xf32>
    %125 = vector.shape_cast %124 : vector<24xf32> to vector<24x1xf32>
    %126 = vector.broadcast %125 : vector<24x1xf32> to vector<24x24xf32>
    %127 = arith.subf %123, %126 : vector<24x24xf32>
    %128 = math.exp %127 : vector<24x24xf32>
    %cst_36 = arith.constant dense<0.000000e+00> : vector<24xf32>
    %129 = vector.multi_reduction <add>, %128, %cst_36 [1] : vector<24x24xf32> to vector<24xf32>
    %130 = vector.shape_cast %129 : vector<24xf32> to vector<24x1xf32>
    %131 = tpu.reciprocal %130 {approx = true} : vector<24x1xf32> -> vector<24x1xf32>
    %132 = vector.broadcast %131 : vector<24x1xf32> to vector<24x24xf32>
    %133 = arith.mulf %128, %132 : vector<24x24xf32>
    %134 = arith.truncf %133 : vector<24x24xf32> to vector<24x24xbf16>
    "tpu.trace_start"() <{level = 10 : i32, message = "nm,md->nd"}> : () -> ()
    %cst_37 = arith.constant dense<0.000000e+00> : vector<24x8xf32>
    %135 = tpu.matmul %134, %118, %cst_37 {dimension_numbers = #tpu.dot_dimension_numbers<[1], [0], [0], [1], [0, 0, 1, 1], [], []>} : vector<24x24xbf16>, vector<24x8xbf16>, vector<24x8xf32> -> vector<24x8xf32>
    "tpu.trace_stop"() : () -> ()
    %136 = tpu.concatenate %66, %89, %112, %135 in 1 : vector<24x8xf32>, vector<24x8xf32>, vector<24x8xf32>, vector<24x8xf32> -> vector<24x32xf32>
    %137 = arith.truncf %136 : vector<24x32xf32> to vector<24x32xbf16>
    %c0_38 = arith.constant 0 : index
    %c0_39 = arith.constant 0 : index
    %138 = vector.load %arg5[%c0_38, %c0_39] : memref<32x128xbf16, #tpu.memory_space<vmem>>, vector<32x128xbf16>
    %cst_40 = arith.constant dense<0.000000e+00> : vector<24x128xf32>
    %139 = tpu.matmul %137, %138, %cst_40 {dimension_numbers = #tpu.dot_dimension_numbers<[1], [0], [0], [1], [0, 0, 1, 1], [], []>} : vector<24x32xbf16>, vector<32x128xbf16>, vector<24x128xf32> -> vector<24x128xf32>
    %c0_41 = arith.constant 0 : index
    %c0_42 = arith.constant 0 : index
    %140 = vector.load %arg6[%c0_41, %c0_42] : memref<1x128xf32, #tpu.memory_space<vmem>>, vector<1x128xf32>
    %141 = vector.broadcast %140 : vector<1x128xf32> to vector<24x128xf32>
    %142 = arith.addf %139, %141 : vector<24x128xf32>
    %143 = arith.addf %4, %142 : vector<24x128xf32>
    %c0_43 = arith.constant 0 : index
    %c0_44 = arith.constant 0 : index
    %144 = vector.load %arg7[%c0_43, %c0_44] : memref<1x128xf32, #tpu.memory_space<vmem>>, vector<1x128xf32>
    %c0_45 = arith.constant 0 : index
    %c0_46 = arith.constant 0 : index
    %145 = vector.load %arg8[%c0_45, %c0_46] : memref<1x128xf32, #tpu.memory_space<vmem>>, vector<1x128xf32>
    %cst_47 = arith.constant dense<0.000000e+00> : vector<24xf32>
    %146 = vector.multi_reduction <add>, %143, %cst_47 [1] : vector<24x128xf32> to vector<24xf32>
    %147 = vector.shape_cast %146 : vector<24xf32> to vector<24x1xf32>
    %cst_48 = arith.constant 3.125000e-02 : f32
    %148 = vector.broadcast %cst_48 : f32 to vector<24x1xf32>
    %149 = arith.mulf %147, %148 : vector<24x1xf32>
    %150 = vector.broadcast %149 : vector<24x1xf32> to vector<24x128xf32>
    %151 = arith.subf %143, %150 : vector<24x128xf32>
    %cst_49 = arith.constant 0.000000e+00 : f32
    %152 = vector.shape_cast %2 : vector<1x128xi1> to vector<1x128xi1>
    %153 = vector.broadcast %152 : vector<1x128xi1> to vector<24x128xi1>
    %154 = vector.broadcast %cst_49 : f32 to vector<24x128xf32>
    %155 = arith.select %153, %151, %154 : vector<24x128xi1>, vector<24x128xf32>
    %156 = arith.mulf %155, %155 : vector<24x128xf32>
    %cst_50 = arith.constant dense<0.000000e+00> : vector<24xf32>
    %157 = vector.multi_reduction <add>, %156, %cst_50 [1] : vector<24x128xf32> to vector<24xf32>
    %158 = vector.shape_cast %157 : vector<24xf32> to vector<24x1xf32>
    %cst_51 = arith.constant 3.125000e-02 : f32
    %159 = vector.broadcast %cst_51 : f32 to vector<24x1xf32>
    %160 = arith.mulf %158, %159 : vector<24x1xf32>
    %cst_52 = arith.constant 9.99999974E-6 : f32
    %161 = vector.broadcast %cst_52 : f32 to vector<24x1xf32>
    %162 = arith.addf %160, %161 : vector<24x1xf32>
    %163 = math.rsqrt %162 : vector<24x1xf32>
    %164 = vector.broadcast %163 : vector<24x1xf32> to vector<24x128xf32>
    %165 = arith.mulf %155, %164 : vector<24x128xf32>
    %166 = vector.broadcast %144 : vector<1x128xf32> to vector<24x128xf32>
    %167 = arith.mulf %165, %166 : vector<24x128xf32>
    %168 = vector.broadcast %145 : vector<1x128xf32> to vector<24x128xf32>
    %169 = arith.addf %167, %168 : vector<24x128xf32>
    %170 = arith.truncf %169 : vector<24x128xf32> to vector<24x128xbf16>
    %c0_53 = arith.constant 0 : index
    %c0_54 = arith.constant 0 : index
    %171 = vector.load %arg9[%c0_53, %c0_54] : memref<128x128xbf16, #tpu.memory_space<vmem>>, vector<128x128xbf16>
    %cst_55 = arith.constant dense<0.000000e+00> : vector<24x128xf32>
    %172 = tpu.matmul %170, %171, %cst_55 {dimension_numbers = #tpu.dot_dimension_numbers<[1], [0], [0], [1], [0, 0, 1, 1], [], []>} : vector<24x128xbf16>, vector<128x128xbf16>, vector<24x128xf32> -> vector<24x128xf32>
    %c0_56 = arith.constant 0 : index
    %c0_57 = arith.constant 0 : index
    %173 = vector.load %arg10[%c0_56, %c0_57] : memref<1x128xf32, #tpu.memory_space<vmem>>, vector<1x128xf32>
    %174 = vector.broadcast %173 : vector<1x128xf32> to vector<24x128xf32>
    %175 = arith.addf %172, %174 : vector<24x128xf32>
    %cst_58 = arith.constant 5.000000e-01 : f32
    %176 = vector.broadcast %cst_58 : f32 to vector<24x128xf32>
    %177 = arith.mulf %176, %175 : vector<24x128xf32>
    %cst_59 = arith.constant 0.707106769 : f32
    %178 = vector.broadcast %cst_59 : f32 to vector<24x128xf32>
    %179 = arith.mulf %175, %178 : vector<24x128xf32>
    %cst_60 = arith.constant 0.000000e+00 : f32
    %180 = vector.broadcast %cst_60 : f32 to vector<24x128xf32>
    %181 = arith.cmpf oge, %179, %180 : vector<24x128xf32>
    %cst_61 = arith.constant 1.000000e+00 : f32
    %cst_62 = arith.constant -1.000000e+00 : f32
    %182 = vector.broadcast %cst_61 : f32 to vector<24x128xf32>
    %183 = vector.broadcast %cst_62 : f32 to vector<24x128xf32>
    %184 = arith.select %181, %182, %183 : vector<24x128xi1>, vector<24x128xf32>
    %cst_63 = arith.constant 0.000000e+00 : f32
    %185 = vector.broadcast %cst_63 : f32 to vector<24x128xf32>
    %186 = arith.cmpf oge, %179, %185 : vector<24x128xf32>
    %cst_64 = arith.constant 0.000000e+00 : f32
    %187 = vector.broadcast %cst_64 : f32 to vector<24x128xf32>
    %188 = arith.subf %187, %179 : vector<24x128xf32>
    %189 = arith.select %186, %179, %188 : vector<24x128xi1>, vector<24x128xf32>
    %cst_65 = arith.constant 0.327591091 : f32
    %190 = vector.broadcast %cst_65 : f32 to vector<24x128xf32>
    %191 = arith.mulf %190, %189 : vector<24x128xf32>
    %cst_66 = arith.constant 1.000000e+00 : f32
    %192 = vector.broadcast %cst_66 : f32 to vector<24x128xf32>
    %193 = arith.addf %192, %191 : vector<24x128xf32>
    %cst_67 = arith.constant 1.000000e+00 : f32
    %194 = vector.broadcast %cst_67 : f32 to vector<24x128xf32>
    %195 = arith.divf %194, %193 : vector<24x128xf32>
    %cst_68 = arith.constant 1.06140542 : f32
    %196 = vector.broadcast %cst_68 : f32 to vector<24x128xf32>
    %197 = arith.mulf %195, %196 : vector<24x128xf32>
    %cst_69 = arith.constant -1.45315206 : f32
    %198 = vector.broadcast %cst_69 : f32 to vector<24x128xf32>
    %199 = arith.addf %198, %197 : vector<24x128xf32>
    %200 = arith.mulf %195, %199 : vector<24x128xf32>
    %cst_70 = arith.constant 1.42141378 : f32
    %201 = vector.broadcast %cst_70 : f32 to vector<24x128xf32>
    %202 = arith.addf %201, %200 : vector<24x128xf32>
    %203 = arith.mulf %195, %202 : vector<24x128xf32>
    %cst_71 = arith.constant -0.284496725 : f32
    %204 = vector.broadcast %cst_71 : f32 to vector<24x128xf32>
    %205 = arith.addf %204, %203 : vector<24x128xf32>
    %206 = arith.mulf %195, %205 : vector<24x128xf32>
    %cst_72 = arith.constant 0.254829586 : f32
    %207 = vector.broadcast %cst_72 : f32 to vector<24x128xf32>
    %208 = arith.addf %207, %206 : vector<24x128xf32>
    %209 = arith.mulf %195, %208 : vector<24x128xf32>
    %cst_73 = arith.constant 0.000000e+00 : f32
    %210 = vector.broadcast %cst_73 : f32 to vector<24x128xf32>
    %211 = arith.subf %210, %189 : vector<24x128xf32>
    %212 = arith.mulf %211, %189 : vector<24x128xf32>
    %213 = math.exp %212 : vector<24x128xf32>
    %214 = arith.mulf %209, %213 : vector<24x128xf32>
    %cst_74 = arith.constant 1.000000e+00 : f32
    %215 = vector.broadcast %cst_74 : f32 to vector<24x128xf32>
    %216 = arith.subf %215, %214 : vector<24x128xf32>
    %217 = arith.mulf %184, %216 : vector<24x128xf32>
    %cst_75 = arith.constant 1.000000e+00 : f32
    %218 = vector.broadcast %cst_75 : f32 to vector<24x128xf32>
    %219 = arith.addf %218, %217 : vector<24x128xf32>
    %220 = arith.mulf %177, %219 : vector<24x128xf32>
    %221 = arith.truncf %220 : vector<24x128xf32> to vector<24x128xbf16>
    %c0_76 = arith.constant 0 : index
    %c0_77 = arith.constant 0 : index
    %222 = vector.load %arg11[%c0_76, %c0_77] : memref<128x128xbf16, #tpu.memory_space<vmem>>, vector<128x128xbf16>
    %cst_78 = arith.constant dense<0.000000e+00> : vector<24x128xf32>
    %223 = tpu.matmul %221, %222, %cst_78 {dimension_numbers = #tpu.dot_dimension_numbers<[1], [0], [0], [1], [0, 0, 1, 1], [], []>} : vector<24x128xbf16>, vector<128x128xbf16>, vector<24x128xf32> -> vector<24x128xf32>
    %c0_79 = arith.constant 0 : index
    %c0_80 = arith.constant 0 : index
    %224 = vector.load %arg12[%c0_79, %c0_80] : memref<1x128xf32, #tpu.memory_space<vmem>>, vector<1x128xf32>
    %225 = vector.broadcast %224 : vector<1x128xf32> to vector<24x128xf32>
    %226 = arith.addf %223, %225 : vector<24x128xf32>
    %227 = arith.addf %143, %226 : vector<24x128xf32>
    %c0_81 = arith.constant 0 : index
    %c0_82 = arith.constant 0 : index
    %c0_83 = arith.constant 0 : index
    %228 = vector.load %arg13[%c0_81, %c0_82, %c0_83] : memref<1x24x128xf32, #tpu.memory_space<vmem>>, vector<1x24x128xf32>
    %229 = vector.shape_cast %228 : vector<1x24x128xf32> to vector<24x128xf32>
    %230 = vector.shape_cast %227 : vector<24x128xf32> to vector<1x24x128xf32>
    tpu.vector_store %arg13[%c0_81, %c0_82, %c0_83], %230 {strides = array<i32>} : memref<1x24x128xf32, #tpu.memory_space<vmem>>, vector<1x24x128xf32>,
    return
  }
  func.func @transform_0(%arg0: i32) -> (i32, i32, i32) {
    %c0_i32 = arith.constant 0 : i32
    %c0_i32_0 = arith.constant 0 : i32
    %c0_i32_1 = arith.constant 0 : i32
    return %arg0, %c0_i32, %c0_i32_0 : i32, i32, i32
  }
  func.func @transform_1(%arg0: i32) -> (i32, i32) {
    %c0_i32 = arith.constant 0 : i32
    %c0_i32_0 = arith.constant 0 : i32
    %c0_i32_1 = arith.constant 0 : i32
    return %c0_i32, %c0_i32_0 : i32, i32
  }
  func.func @transform_2(%arg0: i32) -> (i32, i32) {
    %c0_i32 = arith.constant 0 : i32
    %c0_i32_0 = arith.constant 0 : i32
    %c0_i32_1 = arith.constant 0 : i32
    return %c0_i32, %c0_i32_0 : i32, i32
  }
  func.func @transform_3(%arg0: i32) -> (i32, i32) {
    %c0_i32 = arith.constant 0 : i32
    %c0_i32_0 = arith.constant 0 : i32
    %c0_i32_1 = arith.constant 0 : i32
    return %c0_i32, %c0_i32_0 : i32, i32
  }
  func.func @transform_4(%arg0: i32) -> (i32, i32) {
    %c0_i32 = arith.constant 0 : i32
    %c0_i32_0 = arith.constant 0 : i32
    %c0_i32_1 = arith.constant 0 : i32
    return %c0_i32, %c0_i32_0 : i32, i32
  }
  func.func @transform_5(%arg0: i32) -> (i32, i32) {
    %c0_i32 = arith.constant 0 : i32
    %c0_i32_0 = arith.constant 0 : i32
    %c0_i32_1 = arith.constant 0 : i32
    return %c0_i32, %c0_i32_0 : i32, i32
  }
  func.func @transform_6(%arg0: i32) -> (i32, i32) {
    %c0_i32 = arith.constant 0 : i32
    %c0_i32_0 = arith.constant 0 : i32
    %c0_i32_1 = arith.constant 0 : i32
    return %c0_i32, %c0_i32_0 : i32, i32
  }
  func.func @transform_7(%arg0: i32) -> (i32, i32) {
    %c0_i32 = arith.constant 0 : i32
    %c0_i32_0 = arith.constant 0 : i32
    %c0_i32_1 = arith.constant 0 : i32
    return %c0_i32, %c0_i32_0 : i32, i32
  }
  func.func @transform_8(%arg0: i32) -> (i32, i32) {
    %c0_i32 = arith.constant 0 : i32
    %c0_i32_0 = arith.constant 0 : i32
    %c0_i32_1 = arith.constant 0 : i32
    return %c0_i32, %c0_i32_0 : i32, i32
  }
  func.func @transform_9(%arg0: i32) -> (i32, i32) {
    %c0_i32 = arith.constant 0 : i32
    %c0_i32_0 = arith.constant 0 : i32
    %c0_i32_1 = arith.constant 0 : i32
    return %c0_i32, %c0_i32_0 : i32, i32
  }
  func.func @transform_10(%arg0: i32) -> (i32, i32) {
    %c0_i32 = arith.constant 0 : i32
    %c0_i32_0 = arith.constant 0 : i32
    %c0_i32_1 = arith.constant 0 : i32
    return %c0_i32, %c0_i32_0 : i32, i32
  }
  func.func @transform_11(%arg0: i32) -> (i32, i32) {
    %c0_i32 = arith.constant 0 : i32
    %c0_i32_0 = arith.constant 0 : i32
    %c0_i32_1 = arith.constant 0 : i32
    return %c0_i32, %c0_i32_0 : i32, i32
  }
  func.func @transform_12(%arg0: i32) -> (i32, i32, i32) {
    %c0_i32 = arith.constant 0 : i32
    %c0_i32_0 = arith.constant 0 : i32
    %c0_i32_1 = arith.constant 0 : i32
    return %arg0, %c0_i32, %c0_i32_0 : i32, i32, i32
  }
}

</mosaic_0001>

<bundles_post_ra>
// kernel: block_mixattn_feature_clstoken.1
= control target key start
LH: loop header
LB: loop body
LE: loop exit
PB: predicated region body
PF: predicated region fallthrough
CT: control target
= control target key end

     0   :  { %s2537_s21 = smov 0   ;;  %s2985_s0 = inlined_call_operand.vmem [shape: f32[2,24,128], index: 0, kind: input, shape index: {}, may-alias: {0,12}]   ;;  %s2986_s1 = inlined_call_operand.vmem [shape: f32[1,128], index: 1, kind: input, shape index: {}]   ;;  %s2987_s2 = inlined_call_operand.vmem [shape: f32[1,128], index: 2, kind: input, shape index: {}]   ;;  %s2988_s3 = inlined_call_operand.vmem [shape: bf16[128,384], index: 3, kind: input, shape index: {}]   ;;  %s2989_s4 = inlined_call_operand.vmem [shape: bf16[32,128], index: 4, kind: input, shape index: {}]   ;;  %s2990_s5 = inlined_call_operand.vmem [shape: f32[1,128], index: 5, kind: input, shape index: {}]   ;;  %s2991_s6 = inlined_call_operand.vmem [shape: f32[1,128], index: 6, kind: input, shape index: {}]   ;;  %s2992_s7 = inlined_call_operand.vmem [shape: f32[1,128], index: 7, kind: input, shape index: {}]   ;;  %s2993_s8 = inlined_call_operand.vmem [shape: bf16[128,128], index: 8, kind: input, shape index: {}]   ;;  %s2994_s9 = inlined_call_operand.vmem [shape: f32[1,128], index: 9, kind: input, shape index: {}]   ;;  %s2995_s10 = inlined_call_operand.vmem [shape: bf16[128,128], index: 10, kind: input, shape index: {}]   ;;  %s2996_s11 = inlined_call_operand.vmem [shape: f32[1,128], index: 11, kind: input, shape index: {}]   ;;  %s2997_s12 = inlined_call_operand.vmem [shape: f32[2,24,128], index: 12, kind: output, shape index: {}, may-alias: {0,12}]  }
   0x1 LB: > { %s2013_s22 = sadd.s32 4294967295, %s2462_s21   ;;  %p2017_p0 = scmp.ge.s32.totalorder %s2462_s21, 1  ;;  %s2462_s21 = sphi %s2537_s21, %s22_s21  }
   0x2   : > { %p362_p1 = scmp.lt.s32.totalorder %s2462_s21, 3 }
   0x4   : > { %p363_p2 = pnand %p2017_p0, %p362_p1 }
   0x5   : > { %p404_p3 = scmp.lt.s32.totalorder (!%p363_p2), %s2013_s22, 1  ;;  %v2331_v3 = vld [vmem:[%s2988_s3 + $0x4] ss:$12 sps:$4 sm:$0xff] (!%p363_p2)   ;;  %v2333_v4 = vld [vmem:[%s2988_s3] ss:$12 sps:$4 sm:$0xff] (!%p363_p2)   ;;  %v415_v7 = vlaneseq (!%p363_p2)  ;;  %v2464_v40 = vmov (!%p363_p2), 0  }
   0x6   : > { %366 = sbr.rel (%p363_p2) target bundleno = 4130 (0x1022), region = 68  ;;  %v2334_v5 = vld [vmem:[%s2988_s3 + $0x8] ss:$12 sps:$4 sm:$0xff] (!%p363_p2)   ;;  %641 = vmatprep.subr.bf16.mxu0 (!%p363_p2), %v2331_v3  ;;  %v2337_v24 = vld [vmem:[%s2988_s3 + $0x18] ss:$12 sps:$4 sm:$0xff] (!%p363_p2)   ;;  %673 = vmatprep.mubr.bf16.mxu0 (!%p363_p2), %v2464_v40  ;;  %vm761_vm1 = vcmask (!%p363_p2), 64512  }
   0x7   : > { %v2335_v6 = vld [vmem:[%s2988_s3 + $0x1c] ss:$12 sps:$4 sm:$0xff] (!%p363_p2)   ;;  %2155 = vmatprep.subr.bf16.mxu1 (!%p363_p2), %v2334_v5  ;;  %642 = vmatpush1.bf16.msra.mxu0 (!%p363_p2), %v2333_v4  ;;  %v2571_v8 = vand.u32 (!%p363_p2), 127, %v415_v7  ;;  %v2338_v25 = vld [vmem:[%s2988_s3 + $0x20] ss:$12 sps:$4 sm:$0xff] (!%p363_p2)   ;;  %vm870_vm2 = vcmask (!%p363_p2), 1043456  }
   0x8   : > { %2156 = vmatpush3.bf16.msra.mxu1 (!%p363_p2), %v2334_v5  ;;  %643 = vmatprep.subr.bf16.mxu0 (!%p363_p2), %v2335_v6  ;;  %v2339_v26 = vld [vmem:[%s2988_s3 + $0x34] ss:$12 sps:$4 sm:$0xff] (!%p363_p2)   ;;  %v2341_v27 = vld [vmem:[%s2988_s3 + $0x30] ss:$12 sps:$4 sm:$0xff] (!%p363_p2)   ;;  %v2342_v28 = vld [vmem:[%s2988_s3 + $0x38] ss:$12 sps:$4 sm:$0xff] (!%p363_p2)  }
   0x9   : > { %vm417_vm0 = vcmp.lt.s32.totalorder (!%p363_p2), %v2571_v8, 32  ;;  %2157 = vmatprep.subr.bf16.mxu1 (!%p363_p2), %v2338_v25  ;;  %v2343_v29 = vld [vmem:[%s2988_s3 + $0x4c] ss:$12 sps:$4 sm:$0xff] (!%p363_p2)   ;;  %v2345_v30 = vld [vmem:[%s2988_s3 + $0x48] ss:$12 sps:$4 sm:$0xff] (!%p363_p2)   ;;  %vm748_vm4 = vcmp.ge.s32.totalorder (!%p363_p2), %v2571_v8, 1 }
   0xa   : > { %v2346_v31 = vld [vmem:[%s2988_s3 + $0x50] ss:$12 sps:$4 sm:$0xff] (!%p363_p2)   ;;  %v2349_v33 = vld [vmem:[%s2988_s3 + $0x60] ss:$12 sps:$4 sm:$0xff] (!%p363_p2)   ;;  %v2350_v34 = vld [vmem:[%s2988_s3 + $0x68] ss:$12 sps:$4 sm:$0xff] (!%p363_p2)  }
   0xb   : > { %644 = vmatpush1.bf16.msra.mxu0 (!%p363_p2), %v2337_v24  ;;  %v2347_v32 = vld [vmem:[%s2988_s3 + $0x64] ss:$12 sps:$4 sm:$0xff] (!%p363_p2)   ;;  %v2351_v35 = vld [vmem:[%s2988_s3 + $0x7c] ss:$12 sps:$4 sm:$0xff] (!%p363_p2)   ;;  %v2354_v36 = vld [vmem:[%s2988_s3 + $0x80] ss:$12 sps:$4 sm:$0xff] (!%p363_p2)  }
   0xc   : > { %2158 = vmatpush3.bf16.msra.mxu1 (!%p363_p2), %v2338_v25  ;;  %645 = vmatprep.subr.bf16.mxu0 (!%p363_p2), %v2339_v26  ;;  %v2353_v37 = vld [vmem:[%s2988_s3 + $0x78] ss:$12 sps:$4 sm:$0xff] (!%p363_p2)   ;;  %v2355_v38 = vld [vmem:[%s2988_s3 + $0x94] ss:$12 sps:$4 sm:$0xff] (!%p363_p2)   ;;  %v2357_v41 = vld [vmem:[%s2988_s3 + $0x90] ss:$12 sps:$4 sm:$0xff] (!%p363_p2)  }
   0xd   : > { %s3003_s22 = smov (!%p404_p3, %s2013_s22), 1  ;;  %2159 = vmatprep.subr.bf16.mxu1 %v2342_v28  ;;  %v2358_v39 = vld [vmem:[%s2988_s3 + $0x98] ss:$12 sps:$4 sm:$0xff]   ;;  %v2362_v43 = vld [vmem:[%s2988_s3 + $0xb0] ss:$12 sps:$4 sm:$0xff]   ;;  %vm744_vm5 = vcmp.lt.s32.totalorder %v2571_v8, 17 }
   0xe   : > { %s2299_s23 = smul.u32 24, %s3003_s22  ;;  %v2359_v42 = vld [vmem:[%s2988_s3 + $0xac] ss:$12 sps:$4 sm:$0xff]   ;;  %v2361_v44 = vld [vmem:[%s2988_s3 + $0xa8] ss:$12 sps:$4 sm:$0xff]   ;;  %vm828_vm8 = vcmask 195584   ;;  %vm2698_vm9 = vmand %vm744_vm5, %vm748_vm4 }
   0xf   : > { %646 = vmatpush1.bf16.msra.mxu0 %v2341_v27  ;;  %v2020_v56 = vld [vmem:[%s2986_s1] ss:$0 sm:$0xff]  ;;  %s2465_s19 = smov 120   ;;  %s2466_s20 = smov 112   ;;  %vm1480_vm10 = vcmask 130048   ;;  %vm1512_vm11 = vcmask 261120  }
  0x10   : > { %s2553_s26 = scalar_lea.vmem %s2985_s0, %s2299_s23  ;;  %2160 = vmatpush3.bf16.msra.mxu1 %v2342_v28  ;;  %647 = vmatprep.subr.bf16.mxu0 %v2343_v29  ;;  %v2021_v62 = vld [vmem:[%s2987_s2] ss:$0 sm:$0xff]  ;;  %v741_v29 = vshrl.u32 %v415_v7, 7  ;;  %s2467_s24 = smov 104   ;;  %v2368_v8 = vld [vmem:[%s2993_s8 + $0x18] sm:$0xff]  }
  0x11   : > { %v418_v0 = vld [vmem:[%s2553_s26] sm:$0xff]  ;;  %v420_v1 = vld [vmem:[%s2553_s26 + $0x10] sm:$0xff]  ;;  %v419_v2 = vld [vmem:[%s2553_s26 + $0x8] sm:$0xff]  ;;  %2161 = vmatprep.subr.bf16.mxu1 %v2346_v31  ;;  %s2468_s25 = smov 8   ;;  %s2469_s27 = smov 16  }
  0x12   : > { %423 = vadd.xlane.f32.xlu0 %v418_v0  ;;  %427 = vadd.xlane.f32.xlu1 %v420_v1  ;;  %vm745_vm3 = vcmp.eq.s32.totalorder %v741_v29, 0  ;;  %s2470_s14 = smov 24  }
  0x13   : > { %648 = vmatpush1.bf16.msra.mxu0 %v2345_v30  ;;  %vm749_vm6 = vmor %vm745_vm3, %vm748_vm4 }
  0x14   : > { %2162 = vmatpush3.bf16.msra.mxu1 %v2346_v31  ;;  %649 = vmatprep.subr.bf16.mxu0 %v2347_v32  ;;  %vm2694_vm7 = vmand %vm744_vm5, %vm749_vm6 }
  0x15   : > { %2163 = vmatprep.subr.bf16.mxu1 %v2350_v34 }
  0x16   : > { %425 = vadd.xlane.f32.xlu0 %v419_v2 }
  0x17   : > { %650 = vmatpush1.bf16.msra.mxu0 %v2349_v33 }
  0x18   : > { %2164 = vmatpush3.bf16.msra.mxu1 %v2350_v34  ;;  %651 = vmatprep.subr.bf16.mxu0 %v2351_v35 }
  0x19   : > { %2165 = vmatprep.subr.bf16.mxu1 %v2354_v36 }
  0x1b   : > { %652 = vmatpush1.bf16.msra.mxu0 %v2353_v37 }
  0x1c   : > { %2166 = vmatpush3.bf16.msra.mxu1 %v2354_v36  ;;  %653 = vmatprep.subr.bf16.mxu0 %v2355_v38 }
  0x1d   : > { %2167 = vmatprep.subr.bf16.mxu1 %v2358_v39 }
  0x1f   : > { %654 = vmatpush1.bf16.msra.mxu0 %v2357_v41 }
  0x20   : > { %2168 = vmatpush3.bf16.msra.mxu1 %v2358_v39  ;;  %655 = vmatprep.subr.bf16.mxu0 %v2359_v42 }
  0x21   : > { %2169 = vmatprep.subr.bf16.mxu1 %v2362_v43 }
  0x23   : > { %656 = vmatpush1.bf16.msra.mxu0 %v2361_v44 }
  0x24   : > { %2170 = vmatpush3.bf16.msra.mxu1 %v2362_v43 }
  0x9f   : > { %v424_v9 = vpop.xlane.xlu0 %423  ;;  %v428_v10 = vpop.xlane.xlu1 %427 }
  0xa0   : > { %v429_v11 = vmul.f32 0.03125, %v424_v9  ;;  %v431_v12 = vmul.f32 0.03125, %v428_v10 }
  0xa2   : > { %v432_v13 = vsub.f32 %v418_v0, %v429_v11  ;;  %v434_v14 = vsub.f32 %v420_v1, %v431_v12 }
  0xa3   : > { %v426_v15 = vpop.xlane.xlu0 %425 }
  0xa4   : > { %v430_v16 = vmul.f32 0.03125, %v426_v15  ;;  %v2576_v17 = vsel %vm417_vm0, %v432_v13, 0.0  ;;  %v2580_v18 = vsel %vm417_vm0, %v434_v14, 0.0 }
  0xa5   : > { %v440_v19 = vmul.f32 %v2576_v17, %v2576_v17  ;;  %v442_v21 = vmul.f32 %v2580_v18, %v2580_v18 }
  0xa6   : > { %v433_v20 = vsub.f32 %v419_v2, %v430_v16 }
  0xa7   : > { %443 = vadd.xlane.f32.xlu1 %v440_v19 }
  0xa8   : > { %v2588_v22 = vsel %vm417_vm0, %v433_v20, 0.0 }
  0xa9   : > { %v441_v23 = vmul.f32 %v2588_v22, %v2588_v22 }
  0xab   : > { %447 = vadd.xlane.f32.xlu1 %v442_v21  ;;  %445 = vadd.xlane.f32.xlu0 %v441_v23 }
 0x134   : > { %v444_v45 = vpop.xlane.xlu1 %443 }
 0x135   : > { %v449_v46 = vmul.f32 0.03125, %v444_v45 }
 0x137   : > { %v452_v47 = vadd.f32 1e-05, %v449_v46 }
 0x138   : > { %v448_v48 = vpop.xlane.xlu1 %447  ;;  %v446_v49 = vpop.xlane.xlu0 %445 }
 0x139   : > { %2381 = vrsqrt.f32 %v452_v47  ;;  %v451_v50 = vmul.f32 0.03125, %v448_v48  ;;  %v450_v51 = vmul.f32 0.03125, %v446_v49 }
 0x13b   : > { %v454_v52 = vadd.f32 1e-05, %v451_v50  ;;  %v453_v53 = vadd.f32 1e-05, %v450_v51 }
 0x13d   : > { %2383 = vrsqrt.f32 %v454_v52 }
 0x13e   : > { %2385 = vrsqrt.f32 %v453_v53 }
 0x143   : > { %v2382_v54 = vpop.eup %2381 }
 0x144   : > { %v458_v55 = vmul.f32 %v2382_v54, %v2576_v17 }
 0x146   : > { %v467_v61 = vmul.f32 %v2020_v56, %v458_v55 }
 0x147   : > { %v2384_v57 = vpop.eup %2383 }
 0x148   : > { %v2386_v58 = vpop.eup %2385  ;;  %v460_v59 = vmul.f32 %v2384_v57, %v2580_v18  ;;  %v476_v2 = vadd.f32 %v2021_v62, %v467_v61 }
 0x149   : > { %v459_v60 = vmul.f32 %v2386_v58, %v2588_v22 }
 0x14a   : > { %v469_v63 = vmul.f32 %v2020_v56, %v460_v59 }
 0x14b   : > { %v468_v0 = vmul.f32 %v2020_v56, %v459_v60 }
 0x14c   : > { %v478_v1 = vadd.f32 %v2021_v62, %v469_v63 }
 0x14d   : > { %v477_v3 = vadd.f32 %v2021_v62, %v468_v0 }
 0x14e   : > { %v480_v4 = vpack.c.bf16 %v478_v1, %v478_v1 }
 0x14f   : > { %v479_v5 = vpack.c.bf16 %v477_v3, %v476_v2 }
 0x151   : > { %674 = vmatmul.mubr.bf16.vlgmr.msra.gmra.mrb[0].mxu0 %v479_v5  ;;  %2171 = vmatprep.mubr.bf16.mxu1 %v479_v5 }
 0x152   : > { %2172 = vmatmul.mubr.bf16.vlgmr.msra.gmra.mrb[0].mxu1 %v480_v4  ;;  %683 = vmatprep.mubr.bf16.mxu0 %v2464_v40 }
 0x159   : > { %684 = vmatmul.mubr.bf16.gmra.mrb[4].mxu0 %v480_v4 }
 0x224   : > { %v675_v6 = vpop.f32.mrb[0].mxu0 }
 0x225   : > { %v677_v9 = vpop.f32.mrb[1].mxu0  ;;  %v2173_v10 = vpop.f32.mrb[0].mxu1 }
 0x226   : > { %v679_v11 = vpop.f32.mrb[2].mxu0  ;;  %v726_v12 = vpop.f32.mrb[1].mxu1  ;;  %v2673_v20 = vpack.c.bf16 %v2173_v10, %v2173_v10 }
 0x227   : > { %v2661_v13 = vpack.c.bf16 %v679_v11, %v675_v6  ;;  %v681_v14 = vpop.f32.mrb[3].mxu0  ;;  %v2174_v15 = vpop.f32.mrb[2].mxu1 }
 0x228   : > { %v2663_v16 = vpack.c.bf16 %v681_v14, %v677_v9  ;;  %v729_v17 = vpop.f32.mrb[3].mxu1  ;;  %v872_v26 = vsel %vm870_vm2, %v2673_v20, 0 }
 0x229   : > { %v2665_v18 = vpack.c.bf16 %v729_v17, %v726_v12  ;;  %2179 = vmatprep.mubr.msk.bf16.mxu0 %vm761_vm1, %v2661_v13 }
 0x22a   : > { %2287 = vmatprep.subr.msk.bf16.mxu0 %vm761_vm1, %v2663_v16  ;;  %v769_v19 = vsel %vm761_vm1, %v2663_v16, 0 }
 0x22b   : > { %2176 = vmatpush3.bf16.xpose.msra.mxu0 %v769_v19  ;;  %2183 = vmatprep.subr.bf16.mxu1 %v2665_v18 }
 0x22c   : > { %v685_v21 = vpop.f32.mrb[4].mxu0  ;;  %2184 = vmatpush3.bf16.msra.mxu1 %v2665_v18 }
 0x22d   : > { %v687_v22 = vpop.f32.mrb[5].mxu0  ;;  %2289 = vmatprep.subr.msk.bf16.mxu1 %vm870_vm2, %v2673_v20  ;;  %v2687_v28 = vpack.c.bf16 %v685_v21, %v685_v21 }
 0x22e   : > { %v2679_v23 = vpack.c.bf16 %v687_v22, %v687_v22  ;;  %v689_v24 = vpop.f32.mrb[6].mxu0 }
 0x22f   : > { %v690_v25 = vpop.f32.mrb[7].mxu0 }
 0x230   : > { %2288 = vmatprep.subr.msk.bf16.mxu0 %vm761_vm1, %v2679_v23  ;;  %2186 = vmatpush3.bf16.msra.mxu1 %v872_v26  ;;  %v772_v27 = vsel %vm761_vm1, %v2679_v23, 0 }
 0x233   : > { %2178 = vmatpush3.bf16.xpose.msra.mxu0 %v772_v27 }
 0x23a   : > { %2180 = vmatmul.mubr.msk.bf16.vlgmr.msra.gmra.mrb[8].mxu0 %vm761_vm1, %v2687_v28 }
 0x30d   : > { %v2181_v30 = vpop.f32.mrb[8].mxu0 }
 0x30e   : > { %v808_v31 = vpop.f32.mrb[9].mxu0  ;;  %v824_v33 = vmul.f32 0.35355338, %v2181_v30 }
 0x30f   : > { %v822_v34 = vmul.f32 0.35355338, %v808_v31  ;;  %v2182_v35 = vpop.f32.mrb[10].mxu0 }
 0x310   : > { %v811_v36 = vpop.f32.mrb[11].mxu0  ;;  %v827_v41 = vsel %vm2698_vm9, %v824_v33, -1e+30 }
 0x311   : > { %v823_v7 = vmul.f32 0.35355338, %v811_v36  ;;  %v825_v38 = vsel %vm2694_vm7, %v822_v34, -1e+30  ;;  %v835_v43 = vsel %vm828_vm8, %v827_v41, -inf }
 0x312   : > { %v829_v39 = vsel %vm828_vm8, %v825_v38, -inf }
 0x313   : > { %830 = vmax.xlane.f32.xlu0 %v829_v39  ;;  %v826_v40 = vsel %vm2698_vm9, %v823_v7, -1e+30 }
 0x314   : > { %v832_v42 = vsel %vm828_vm8, %v826_v40, -inf }
 0x315   : > { %833 = vmax.xlane.f32.xlu1 %v832_v42 }
 0x317   : > { %836 = vmax.xlane.f32.xlu0 %v835_v43 }
 0x3a0   : > { %v831_v44 = vpop.xlane.xlu0 %830 }
 0x3a1   : > { %v838_v45 = vsub.f32 %v825_v38, %v831_v44 }
 0x3a2   : > { %v834_v46 = vpop.xlane.xlu1 %833 }
 0x3a3   : > { %v841_v47 = vmul.f32 1.442695, %v838_v45  ;;  %v839_v48 = vsub.f32 %v826_v40, %v834_v46 }
 0x3a4   : > { %v837_v49 = vpop.xlane.xlu0 %836 }
 0x3a5   : > { %2387 = vpow2.f32 %v841_v47  ;;  %v843_v50 = vmul.f32 1.442695, %v839_v48  ;;  %v840_v51 = vsub.f32 %v827_v41, %v837_v49 }
 0x3a7   : > { %2389 = vpow2.f32 %v843_v50  ;;  %v845_v52 = vmul.f32 1.442695, %v840_v51 }
 0x3a9   : > { %2391 = vpow2.f32 %v845_v52 }
 0x3af   : > { %v2388_v53 = vpop.eup %2387 }
 0x3b0   : > { %v847_v54 = vsel %vm828_vm8, %v2388_v53, 0.0 }
 0x3b1   : > { %v2390_v55 = vpop.eup %2389  ;;  %848 = vadd.xlane.f32.xlu1 %v847_v54 }
 0x3b2   : > { %v850_v56 = vsel %vm828_vm8, %v2390_v55, 0.0 }
 0x3b3   : > { %v2392_v57 = vpop.eup %2391  ;;  %851 = vadd.xlane.f32.xlu0 %v850_v56 }
 0x3b4   : > { %v853_v58 = vsel %vm828_vm8, %v2392_v57, 0.0 }
 0x3b5   : > { %854 = vadd.xlane.f32.xlu1 %v853_v58 }
 0x3c6   : > { %932 = vrot.lane.b32.xlu1 %v2679_v23, %s2465_s19 }
 0x3c9   : > { %930 = vrot.lane.b32.xlu0 %v2663_v16, %s2465_s19 }
 0x3ca   : > { %924 = vrot.lane.b32.xlu1 %v2661_v13, %s2465_s19 }
 0x3ce   : > { %926 = vrot.lane.b32.xlu1 %v2687_v28, %s2465_s19 }
 0x43e   : > { %v849_v59 = vpop.xlane.xlu1 %848 }
 0x43f   : > { %2393 = vrcp.f32 %v849_v59 }
 0x440   : > { %v852_v60 = vpop.xlane.xlu0 %851 }
 0x441   : > { %2395 = vrcp.f32 %v852_v60 }
 0x442   : > { %v855_v61 = vpop.xlane.xlu1 %854 }
 0x443   : > { %2397 = vrcp.f32 %v855_v61 }
 0x444   : > { %v931_v62 = vpop.permute.xlu0 %930 }
 0x445   : > { %2290 = vmatprep.subr.msk.bf16.mxu1 %vm761_vm1, %v931_v62  ;;  %v941_v10 = vsel %vm761_vm1, %v931_v62, 0 }
 0x446   : > { %v933_v1 = vpop.permute.xlu1 %932 }
 0x447   : > { %v944_v12 = vsel %vm761_vm1, %v933_v1, 0 }
 0x449   : > { %v2394_v63 = vpop.eup %2393 }
 0x44a   : > { %v859_v2 = vmul.f32 %v2394_v63, %v2388_v53  ;;  %v925_v11 = vpop.permute.xlu1 %924 }
 0x44b   : > { %v2396_v0 = vpop.eup %2395 }
 0x44c   : > { %v860_v3 = vmul.f32 %v2396_v0, %v2390_v55 }
 0x44d   : > { %v2398_v4 = vpop.eup %2397 }
 0x44e   : > { %v861_v5 = vmul.f32 %v2398_v4, %v2392_v57  ;;  %v862_v6 = vpack.c.bf16 %v860_v3, %v859_v2  ;;  %v927_v14 = vpop.permute.xlu1 %926 }
 0x450   : > { %2187 = vmatprep.mubr.msk.bf16.mxu1 %vm828_vm8, %v862_v6  ;;  %v863_v9 = vpack.c.bf16 %v861_v5, %v861_v5 }
 0x452   : > { %2188 = vmatmul.mubr.msk.bf16.vlgmr.msra.gmra.mrb[4].mxu1 %vm828_vm8, %v863_v9 }
 0x453   : > { %2192 = vmatpush3.bf16.xpose.msra.mxu1 %v941_v10  ;;  %2195 = vmatprep.mubr.msk.bf16.mxu1 %vm761_vm1, %v925_v11 }
 0x454   : > { %2291 = vmatprep.subr.msk.bf16.mxu1 %vm761_vm1, %v933_v1 }
 0x45b   : > { %2194 = vmatpush3.bf16.xpose.msra.mxu1 %v944_v12 }
 0x462   : > { %2196 = vmatmul.mubr.msk.bf16.vlgmr.msra.gmra.mrb[8].mxu1 %vm761_vm1, %v927_v14 }
 0x525   : > { %v2730_v15 = vpop.f32.mrb[4].mxu1 }
 0x526   : > { %v2732_v17 = vpop.f32.mrb[5].mxu1 }
 0x527   : > { %v2190_v19 = vpop.f32.mrb[6].mxu1 }
 0x528   : > { %v2734_v21 = vpop.f32.mrb[7].mxu1 }
 0x535   : > { %v2197_v22 = vpop.f32.mrb[8].mxu1 }
 0x536   : > { %v980_v24 = vpop.f32.mrb[9].mxu1  ;;  %v996_v25 = vmul.f32 0.35355338, %v2197_v22 }
 0x537   : > { %v994_v26 = vmul.f32 0.35355338, %v980_v24  ;;  %v2198_v27 = vpop.f32.mrb[10].mxu1 }
 0x538   : > { %v983_v29 = vpop.f32.mrb[11].mxu1  ;;  %v999_v35 = vsel %vm2698_vm9, %v996_v25, -1e+30 }
 0x539   : > { %v995_v30 = vmul.f32 0.35355338, %v983_v29  ;;  %v997_v31 = vsel %vm2694_vm7, %v994_v26, -1e+30  ;;  %v1006_v7 = vsel %vm828_vm8, %v999_v35, -inf }
 0x53a   : > { %v1000_v33 = vsel %vm828_vm8, %v997_v31, -inf }
 0x53b   : > { %1001 = vmax.xlane.f32.xlu0 %v1000_v33  ;;  %v998_v34 = vsel %vm2698_vm9, %v995_v30, -1e+30 }
 0x53c   : > { %v1003_v36 = vsel %vm828_vm8, %v998_v34, -inf }
 0x53d   : > { %1004 = vmax.xlane.f32.xlu1 %v1003_v36 }
 0x53f   : > { %1007 = vmax.xlane.f32.xlu0 %v1006_v7 }
 0x5c8   : > { %v1002_v38 = vpop.xlane.xlu0 %1001 }
 0x5c9   : > { %v1009_v39 = vsub.f32 %v997_v31, %v1002_v38 }
 0x5ca   : > { %v1005_v40 = vpop.xlane.xlu1 %1004 }
 0x5cb   : > { %v1012_v41 = vmul.f32 1.442695, %v1009_v39  ;;  %v1010_v42 = vsub.f32 %v998_v34, %v1005_v40 }
 0x5cc   : > { %v1008_v43 = vpop.xlane.xlu0 %1007 }
 0x5cd   : > { %2399 = vpow2.f32 %v1012_v41  ;;  %v1014_v44 = vmul.f32 1.442695, %v1010_v42  ;;  %v1011_v45 = vsub.f32 %v999_v35, %v1008_v43 }
 0x5cf   : > { %2401 = vpow2.f32 %v1014_v44  ;;  %v1016_v46 = vmul.f32 1.442695, %v1011_v45 }
 0x5d1   : > { %2403 = vpow2.f32 %v1016_v46 }
 0x5d7   : > { %v2400_v47 = vpop.eup %2399 }
 0x5d8   : > { %v1018_v48 = vsel %vm828_vm8, %v2400_v47, 0.0 }
 0x5d9   : > { %v2402_v49 = vpop.eup %2401  ;;  %1019 = vadd.xlane.f32.xlu0 %v1018_v48 }
 0x5da   : > { %v1021_v52 = vsel %vm828_vm8, %v2402_v49, 0.0 }
 0x5db   : > { %v2404_v50 = vpop.eup %2403 }
 0x5dc   : > { %v1024_v51 = vsel %vm828_vm8, %v2404_v50, 0.0 }
 0x5dd   : > { %1025 = vadd.xlane.f32.xlu1 %v1024_v51  ;;  %1022 = vadd.xlane.f32.xlu0 %v1021_v52 }
 0x5ee   : > { %1039 = vrot.lane.b32.xlu1 %v2673_v20, %s2465_s19 }
 0x5f2   : > { %1103 = vrot.lane.b32.xlu1 %v2663_v16, %s2466_s20 }
 0x5f3   : > { %1037 = vrot.lane.b32.xlu0 %v2665_v18, %s2465_s19 }
 0x5f6   : > { %1105 = vrot.lane.b32.xlu1 %v2679_v23, %s2466_s20 }
 0x5f7   : > { %1099 = vrot.lane.b32.xlu0 %v2661_v13, %s2466_s20 }
 0x5fa   : > { %1101 = vrot.lane.b32.xlu1 %v2687_v28, %s2466_s20 }
 0x666   : > { %v1020_v53 = vpop.xlane.xlu0 %1019 }
 0x667   : > { %2405 = vrcp.f32 %v1020_v53 }
 0x66a   : > { %v1023_v54 = vpop.xlane.xlu0 %1022  ;;  %v1026_v55 = vpop.xlane.xlu1 %1025 }
 0x66b   : > { %2407 = vrcp.f32 %v1023_v54 }
 0x66c   : > { %2409 = vrcp.f32 %v1026_v55 }
 0x66e   : > { %v1038_v56 = vpop.permute.xlu0 %1037  ;;  %v1040_v57 = vpop.permute.xlu1 %1039 }
 0x66f   : > { %2199 = vmatprep.subr.bf16.mxu0 %v1038_v56  ;;  %v1049_v59 = vsel %vm870_vm2, %v1040_v57, 0 }
 0x670   : > { %2200 = vmatpush3.bf16.msra.mxu0 %v1038_v56 }
 0x671   : > { %2292 = vmatprep.subr.msk.bf16.mxu0 %vm870_vm2, %v1040_v57  ;;  %v2406_v58 = vpop.eup %2405 }
 0x672   : > { %v1104_v60 = vpop.permute.xlu1 %1103  ;;  %v1030_v63 = vmul.f32 %v2406_v58, %v2400_v47  ;;  %v1100_v4 = vpop.permute.xlu0 %1099 }
 0x673   : > { %v1114_v5 = vsel %vm761_vm1, %v1104_v60, 0 }
 0x674   : > { %2202 = vmatpush3.bf16.msra.mxu0 %v1049_v59 }
 0x675   : > { %v2408_v61 = vpop.eup %2407  ;;  %2293 = vmatprep.subr.msk.bf16.mxu0 %vm761_vm1, %v1104_v60 }
 0x676   : > { %v2410_v62 = vpop.eup %2409  ;;  %v1031_v0 = vmul.f32 %v2408_v61, %v2402_v49  ;;  %v1106_v6 = vpop.permute.xlu1 %1105 }
 0x677   : > { %v1032_v1 = vmul.f32 %v2410_v62, %v2404_v50  ;;  %v1117_v9 = vsel %vm761_vm1, %v1106_v6, 0 }
 0x678   : > { %v1033_v2 = vpack.c.bf16 %v1031_v0, %v1030_v63 }
 0x679   : > { %v1034_v3 = vpack.c.bf16 %v1032_v1, %v1032_v1 }
 0x67a   : > { %2203 = vmatprep.mubr.msk.bf16.mxu0 %vm828_vm8, %v1033_v2  ;;  %v1102_v10 = vpop.permute.xlu1 %1101 }
 0x67b   : > { %2204 = vmatmul.mubr.msk.bf16.vlgmr.msra.gmra.mrb[12].mxu0 %vm828_vm8, %v1034_v3 }
 0x67c   : > { %2211 = vmatprep.mubr.msk.bf16.mxu0 %vm761_vm1, %v1100_v4 }
 0x67d   : > { %2208 = vmatpush3.bf16.xpose.msra.mxu0 %v1114_v5 }
 0x67e   : > { %2294 = vmatprep.subr.msk.bf16.mxu0 %vm761_vm1, %v1106_v6 }
 0x685   : > { %2210 = vmatpush3.bf16.xpose.msra.mxu0 %v1117_v9 }
 0x68c   : > { %2212 = vmatmul.mubr.msk.bf16.vlgmr.msra.gmra.mrb[16].mxu0 %vm761_vm1, %v1102_v10 }
 0x74e   : > { %v2770_v11 = vpop.f32.mrb[12].mxu0 }
 0x74f   : > { %v2772_v12 = vpop.f32.mrb[13].mxu0 }
 0x750   : > { %v2206_v14 = vpop.f32.mrb[14].mxu0 }
 0x751   : > { %v2774_v19 = vpop.f32.mrb[15].mxu0 }
 0x752   : > { %v2316_v22 = vpack.i.bf16 %v2774_v19, %v2772_v12 }
 0x75f   : > { %v2213_v24 = vpop.f32.mrb[16].mxu0 }
 0x760   : > { %v1153_v25 = vpop.f32.mrb[17].mxu0  ;;  %v1169_v26 = vmul.f32 0.35355338, %v2213_v24 }
 0x761   : > { %v1167_v27 = vmul.f32 0.35355338, %v1153_v25  ;;  %v2214_v29 = vpop.f32.mrb[18].mxu0 }
 0x762   : > { %v1156_v30 = vpop.f32.mrb[19].mxu0  ;;  %v1172_v36 = vsel %vm2698_vm9, %v1169_v26, -1e+30 }
 0x763   : > { %v1168_v31 = vmul.f32 0.35355338, %v1156_v30  ;;  %v1170_v33 = vsel %vm2694_vm7, %v1167_v27, -1e+30  ;;  %v1179_v38 = vsel %vm828_vm8, %v1172_v36, -inf }
 0x764   : > { %v1173_v34 = vsel %vm828_vm8, %v1170_v33, -inf }
 0x765   : > { %1174 = vmax.xlane.f32.xlu0 %v1173_v34  ;;  %v1171_v35 = vsel %vm2698_vm9, %v1168_v31, -1e+30 }
 0x766   : > { %v1176_v7 = vsel %vm828_vm8, %v1171_v35, -inf }
 0x767   : > { %1177 = vmax.xlane.f32.xlu1 %v1176_v7 }
 0x769   : > { %1180 = vmax.xlane.f32.xlu0 %v1179_v38 }
 0x7f2   : > { %v1175_v39 = vpop.xlane.xlu0 %1174 }
 0x7f3   : > { %v1182_v40 = vsub.f32 %v1170_v33, %v1175_v39 }
 0x7f4   : > { %v1178_v41 = vpop.xlane.xlu1 %1177 }
 0x7f5   : > { %v1185_v42 = vmul.f32 1.442695, %v1182_v40  ;;  %v1183_v43 = vsub.f32 %v1171_v35, %v1178_v41 }
 0x7f6   : > { %v1181_v44 = vpop.xlane.xlu0 %1180 }
 0x7f7   : > { %2411 = vpow2.f32 %v1185_v42  ;;  %v1187_v45 = vmul.f32 1.442695, %v1183_v43  ;;  %v1184_v46 = vsub.f32 %v1172_v36, %v1181_v44 }
 0x7f9   : > { %2413 = vpow2.f32 %v1187_v45  ;;  %v1189_v47 = vmul.f32 1.442695, %v1184_v46 }
 0x7fb   : > { %2415 = vpow2.f32 %v1189_v47 }
 0x801   : > { %v2412_v48 = vpop.eup %2411 }
 0x802   : > { %v1191_v49 = vsel %vm828_vm8, %v2412_v48, 0.0 }
 0x803   : > { %v2414_v50 = vpop.eup %2413  ;;  %1192 = vadd.xlane.f32.xlu0 %v1191_v49 }
 0x804   : > { %v1194_v53 = vsel %vm828_vm8, %v2414_v50, 0.0 }
 0x805   : > { %v2416_v51 = vpop.eup %2415 }
 0x806   : > { %v1197_v52 = vsel %vm828_vm8, %v2416_v51, 0.0 }
 0x807   : > { %1198 = vadd.xlane.f32.xlu1 %v1197_v52  ;;  %1195 = vadd.xlane.f32.xlu0 %v1194_v53 }
 0x818   : > { %1210 = vrot.lane.b32.xlu1 %v2673_v20, %s2466_s20 }
 0x81c   : > { %1274 = vrot.lane.b32.xlu1 %v2663_v16, %s2467_s24 }
 0x81d   : > { %1208 = vrot.lane.b32.xlu0 %v2665_v18, %s2466_s20 }
 0x820   : > { %1276 = vrot.lane.b32.xlu1 %v2679_v23, %s2467_s24 }
 0x821   : > { %1270 = vrot.lane.b32.xlu0 %v2661_v13, %s2467_s24 }
 0x824   : > { %1272 = vrot.lane.b32.xlu1 %v2687_v28, %s2467_s24 }
 0x890   : > { %v1193_v54 = vpop.xlane.xlu0 %1192 }
 0x891   : > { %2417 = vrcp.f32 %v1193_v54 }
 0x894   : > { %v1196_v55 = vpop.xlane.xlu0 %1195  ;;  %v1199_v56 = vpop.xlane.xlu1 %1198 }
 0x895   : > { %2419 = vrcp.f32 %v1196_v55 }
 0x896   : > { %2421 = vrcp.f32 %v1199_v56 }
 0x898   : > { %v1209_v57 = vpop.permute.xlu0 %1208  ;;  %v1211_v16 = vpop.permute.xlu1 %1210 }
 0x899   : > { %2215 = vmatprep.subr.bf16.mxu1 %v1209_v57  ;;  %v1220_v23 = vsel %vm870_vm2, %v1211_v16, 0 }
 0x89a   : > { %2216 = vmatpush3.bf16.msra.mxu1 %v1209_v57 }
 0x89b   : > { %2295 = vmatprep.subr.msk.bf16.mxu1 %vm870_vm2, %v1211_v16  ;;  %v2418_v58 = vpop.eup %2417 }
 0x89c   : > { %v1275_v59 = vpop.permute.xlu1 %1274  ;;  %v1203_v60 = vmul.f32 %v2418_v58, %v2412_v48  ;;  %v1271_v1 = vpop.permute.xlu0 %1270 }
 0x89d   : > { %v1285_v2 = vsel %vm761_vm1, %v1275_v59, 0 }
 0x89e   : > { %2218 = vmatpush3.bf16.msra.mxu1 %v1220_v23 }
 0x89f   : > { %v2420_v13 = vpop.eup %2419  ;;  %2296 = vmatprep.subr.msk.bf16.mxu1 %vm761_vm1, %v1275_v59  ;;  %v2363_v59 = vld [vmem:[%s2989_s4] sm:$0xff]  }
 0x8a0   : > { %v2422_v28 = vpop.eup %2421  ;;  %v1204_v61 = vmul.f32 %v2420_v13, %v2414_v50  ;;  %v1277_v3 = vpop.permute.xlu1 %1276  ;;  %v2364_v13 = vld [vmem:[%s2989_s4 + $0x8] sm:$0xff]  }
 0x8a1   : > { %v1205_v62 = vmul.f32 %v2422_v28, %v2416_v51  ;;  %v1288_v4 = vsel %vm761_vm1, %v1277_v3, 0 }
 0x8a2   : > { %v1206_v63 = vpack.c.bf16 %v1204_v61, %v1203_v60 }
 0x8a3   : > { %v1207_v0 = vpack.c.bf16 %v1205_v62, %v1205_v62 }
 0x8a4   : > { %2219 = vmatprep.mubr.msk.bf16.mxu1 %vm828_vm8, %v1206_v63  ;;  %v1273_v5 = vpop.permute.xlu1 %1272 }
 0x8a5   : > { %2220 = vmatmul.mubr.msk.bf16.vlgmr.msra.gmra.mrb[12].mxu1 %vm828_vm8, %v1207_v0 }
 0x8a6   : > { %2227 = vmatprep.mubr.msk.bf16.mxu1 %vm761_vm1, %v1271_v1 }
 0x8a7   : > { %2224 = vmatpush3.bf16.xpose.msra.mxu1 %v1285_v2 }
 0x8a8   : > { %2297 = vmatprep.subr.msk.bf16.mxu1 %vm761_vm1, %v1277_v3 }
 0x8af   : > { %2226 = vmatpush3.bf16.xpose.msra.mxu1 %v1288_v4 }
 0x8b6   : > { %2228 = vmatmul.mubr.msk.bf16.vlgmr.msra.gmra.mrb[16].mxu1 %vm761_vm1, %v1273_v5 }
 0x978   : > { %v2221_v6 = vpop.f32.mrb[12].mxu1 }
 0x979   : > { %v1256_v9 = vpop.f32.mrb[13].mxu1 }
 0x97a   : > { %v2222_v10 = vpop.f32.mrb[14].mxu1 }
 0x97b   : > { %v1259_v14 = vpop.f32.mrb[15].mxu1 }
 0x97c   : > { %v2321_v24 = vpack.i.bf16 %v1259_v14, %v1256_v9 }
 0x989   : > { %v2229_v25 = vpop.f32.mrb[16].mxu1 }
 0x98a   : > { %v1324_v26 = vpop.f32.mrb[17].mxu1  ;;  %v1340_v27 = vmul.f32 0.35355338, %v2229_v25 }
 0x98b   : > { %v1338_v29 = vmul.f32 0.35355338, %v1324_v26  ;;  %v2230_v30 = vpop.f32.mrb[18].mxu1 }
 0x98c   : > { %v1327_v31 = vpop.f32.mrb[19].mxu1  ;;  %v1343_v7 = vsel %vm2698_vm9, %v1340_v27, -1e+30 }
 0x98d   : > { %v1339_v33 = vmul.f32 0.35355338, %v1327_v31  ;;  %v1341_v34 = vsel %vm2694_vm7, %v1338_v29, -1e+30  ;;  %v1350_v39 = vsel %vm828_vm8, %v1343_v7, -inf }
 0x98e   : > { %v1344_v35 = vsel %vm828_vm8, %v1341_v34, -inf }
 0x98f   : > { %1345 = vmax.xlane.f32.xlu0 %v1344_v35  ;;  %v1342_v36 = vsel %vm2698_vm9, %v1339_v33, -1e+30 }
 0x990   : > { %v1347_v38 = vsel %vm828_vm8, %v1342_v36, -inf }
 0x991   : > { %1348 = vmax.xlane.f32.xlu1 %v1347_v38 }
 0x993   : > { %1351 = vmax.xlane.f32.xlu0 %v1350_v39 }
 0xa1c   : > { %v1346_v40 = vpop.xlane.xlu0 %1345 }
 0xa1d   : > { %v1353_v41 = vsub.f32 %v1341_v34, %v1346_v40 }
 0xa1e   : > { %v1349_v42 = vpop.xlane.xlu1 %1348 }
 0xa1f   : > { %v1356_v32 = vmul.f32 1.442695, %v1353_v41  ;;  %v1354_v43 = vsub.f32 %v1342_v36, %v1349_v42 }
 0xa20   : > { %v1352_v44 = vpop.xlane.xlu0 %1351 }
 0xa21   : > { %2423 = vpow2.f32 %v1356_v32  ;;  %v1358_v45 = vmul.f32 1.442695, %v1354_v43  ;;  %v1355_v46 = vsub.f32 %v1343_v7, %v1352_v44  ;;  %v2453_v32 = vld [vmem:[%s2553_s26] sm:$0xff] }
 0xa23   : > { %2425 = vpow2.f32 %v1358_v45  ;;  %v1360_v47 = vmul.f32 1.442695, %v1355_v46  ;;  %v2454_v45 = vld [vmem:[%s2553_s26 + $0x8] sm:$0xff] }
 0xa25   : > { %2427 = vpow2.f32 %v1360_v47  ;;  %v2455_v47 = vld [vmem:[%s2553_s26 + $0x10] sm:$0xff] }
 0xa2b   : > { %v2424_v37 = vpop.eup %2423 }
 0xa2c   : > { %v1362_v48 = vsel %vm828_vm8, %v2424_v37, 0.0 }
 0xa2d   : > { %v2426_v49 = vpop.eup %2425  ;;  %1363 = vadd.xlane.f32.xlu0 %v1362_v48  ;;  %v2365_v48 = vld [vmem:[%s2993_s8] sm:$0xff]  }
 0xa2e   : > { %v1365_v52 = vsel %vm828_vm8, %v2426_v49, 0.0  ;;  %2247 = vmatprep.subr.bf16.mxu1 %v2365_v48 }
 0xa2f   : > { %v2428_v50 = vpop.eup %2427  ;;  %2248 = vmatpush3.bf16.msra.mxu1 %v2365_v48 }
 0xa30   : > { %v1368_v51 = vsel %vm828_vm8, %v2428_v50, 0.0 }
 0xa31   : > { %1369 = vadd.xlane.f32.xlu1 %v1368_v51  ;;  %1366 = vadd.xlane.f32.xlu0 %v1365_v52 }
 0xa42   : > { %1381 = vrot.lane.b32.xlu1 %v2673_v20, %s2467_s24 }
 0xa46   : > { %2317 = vrot.lane.b32.xlu1 %v2316_v22, %s2468_s25 }
 0xa47   : > { %1379 = vrot.lane.b32.xlu0 %v2665_v18, %s2467_s24 }
 0xa4a   : > { %1448 = vrot.lane.b32.xlu1 %v2770_v11, %s2468_s25 }
 0xa4b   : > { %2322 = vrot.lane.b32.xlu0 %v2321_v24, %s2469_s27 }
 0xa4e   : > { %1460 = vrot.lane.b32.xlu1 %v2221_v6, %s2469_s27 }
 0xaba   : > { %v1364_v53 = vpop.xlane.xlu0 %1363 }
 0xabb   : > { %2429 = vrcp.f32 %v1364_v53 }
 0xabe   : > { %v1367_v54 = vpop.xlane.xlu0 %1366  ;;  %v1370_v55 = vpop.xlane.xlu1 %1369 }
 0xabf   : > { %2431 = vrcp.f32 %v1367_v54 }
 0xac0   : > { %2433 = vrcp.f32 %v1370_v55 }
 0xac2   : > { %v1380_v20 = vpop.permute.xlu0 %1379  ;;  %v1382_v56 = vpop.permute.xlu1 %1381 }
 0xac3   : > { %2231 = vmatprep.subr.bf16.mxu0 %v1380_v20  ;;  %v1391_v18 = vsel %vm870_vm2, %v1382_v56, 0 }
 0xac4   : > { %2232 = vmatpush3.bf16.msra.mxu0 %v1380_v20 }
 0xac5   : > { %2298 = vmatprep.subr.msk.bf16.mxu0 %vm870_vm2, %v1382_v56  ;;  %v2430_v12 = vpop.eup %2429 }
 0xac6   : > { %v1374_v22 = vmul.f32 %v2430_v12, %v2424_v37  ;;  %v2318_v0 = vpop.permute.xlu1 %2317  ;;  %v2323_v2 = vpop.permute.xlu0 %2322 }
 0xac7   : > { %v2320_v3 = vunpack.i.h.bf16 %v2318_v0  ;;  %v2319_v4 = vunpack.i.l.bf16 %v2318_v0  ;;  %v2325_v6 = vunpack.i.h.bf16 %v2323_v2  ;;  %v2324_v9 = vunpack.i.l.bf16 %v2323_v2 }
 0xac8   : > { %2234 = vmatpush3.bf16.msra.mxu0 %v1391_v18 }
 0xac9   : > { %v2432_v11 = vpop.eup %2431  ;;  %2239 = vmatprep.subr.bf16.mxu0 %v2363_v59  ;;  %v1478_v10 = vsel %vm761_vm1, %v2734_v21, %v2320_v3  ;;  %v1477_v14 = vsel %vm761_vm1, %v2732_v17, %v2319_v4 }
 0xaca   : > { %v2434_v19 = vpop.eup %2433  ;;  %v1375_v57 = vmul.f32 %v2432_v11, %v2426_v49  ;;  %v1449_v1 = vpop.permute.xlu1 %1448  ;;  %v1481_v31 = vsel %vm1480_vm10, %v1477_v14, %v2324_v9  ;;  %v1482_v33 = vsel %vm1480_vm10, %v1478_v10, %v2325_v6  ;;  %v2067_v9 = vld [vmem:[%s2991_s6] ss:$0 sm:$0xff] }
 0xacb   : > { %v1376_v16 = vmul.f32 %v2434_v19, %v2428_v50  ;;  %v1479_v25 = vsel %vm761_vm1, %v2730_v15, %v1449_v1  ;;  %v2062_v15 = vld [vmem:[%s2990_s5] ss:$0 sm:$0xff] }
 0xacc   : > { %v1377_v58 = vpack.c.bf16 %v1375_v57, %v1374_v22 }
 0xacd   : > { %v1378_v23 = vpack.c.bf16 %v1376_v16, %v1376_v16  ;;  %v2366_v16 = vld [vmem:[%s2993_s8 + $0x8] sm:$0xff]  }
 0xace   : > { %2235 = vmatprep.mubr.msk.bf16.mxu0 %vm828_vm8, %v1377_v58  ;;  %v1461_v5 = vpop.permute.xlu1 %1460  ;;  %2249 = vmatprep.subr.bf16.mxu1 %v2366_v16  ;;  %v2367_v58 = vld [vmem:[%s2993_s8 + $0x10] sm:$0xff]  }
 0xacf   : > { %2236 = vmatmul.mubr.msk.bf16.vlgmr.msra.gmra.mrb[20].mxu0 %vm828_vm8, %v1378_v23  ;;  %v1483_v27 = vsel %vm1480_vm10, %v1479_v25, %v1461_v5  ;;  %2250 = vmatpush3.bf16.msra.mxu1 %v2366_v16  ;;  %v2369_v23 = vld [vmem:[%s2993_s8 + $0x20] sm:$0xff]  }
 0xad0   : > { %2240 = vmatpush3.bf16.msra.mxu0 %v2363_v59  ;;  %2251 = vmatprep.subr.bf16.mxu1 %v2367_v58  ;;  %v2370_v59 = vld [vmem:[%s2993_s8 + $0x28] sm:$0xff]  }
 0xad1   : > { %2241 = vmatprep.subr.bf16.mxu0 %v2364_v13 }
 0xad3   : > { %2252 = vmatpush3.bf16.msra.mxu1 %v2367_v58 }
 0xad4   : > { %2242 = vmatpush3.bf16.msra.mxu0 %v2364_v13  ;;  %2253 = vmatprep.subr.bf16.mxu1 %v2368_v8  ;;  %v2371_v13 = vld [vmem:[%s2993_s8 + $0x30] sm:$0xff]  }
 0xad7   : > { %2254 = vmatpush3.bf16.msra.mxu1 %v2368_v8 }
 0xad8   : > { %2255 = vmatprep.subr.bf16.mxu1 %v2369_v23 }
 0xadb   : > { %2256 = vmatpush3.bf16.msra.mxu1 %v2369_v23 }
 0xadc   : > { %2257 = vmatprep.subr.bf16.mxu1 %v2370_v59 }
 0xadf   : > { %2258 = vmatpush3.bf16.msra.mxu1 %v2370_v59 }
 0xae0   : > { %2259 = vmatprep.subr.bf16.mxu1 %v2371_v13 }
 0xae3   : > { %2260 = vmatpush3.bf16.msra.mxu1 %v2371_v13 }
 0xba2   : > { %v2237_v28 = vpop.f32.mrb[20].mxu0 }
 0xba3   : > { %1472 = vrot.lane.b32.xlu1 %v2237_v28, %s2470_s14  ;;  %v1427_v60 = vpop.f32.mrb[21].mxu0  ;;  %v2372_v28 = vld [vmem:[%s2993_s8 + $0x38] sm:$0xff]  }
 0xba4   : > { %v2238_v61 = vpop.f32.mrb[22].mxu0  ;;  %2261 = vmatprep.subr.bf16.mxu1 %v2372_v28 }
 0xba5   : > { %v1430_v62 = vpop.f32.mrb[23].mxu0  ;;  %2262 = vmatpush3.bf16.msra.mxu1 %v2372_v28 }
 0xba6   : > { %v2326_v63 = vpack.i.bf16 %v1430_v62, %v1427_v60 }
 0xba8   : > { %2327 = vrot.lane.b32.xlu0 %v2326_v63, %s2470_s14  ;;  %s413_s14 = scalar_lea.vmem %s2997_s12, %s2299_s23 }
 0xc15   : > { %v1473_v24 = vpop.permute.xlu1 %1472 }
 0xc16   : > { %v1486_v34 = vsel %vm828_vm8, %v1483_v27, %v1473_v24  ;;  %v2068_v27 = vld [vmem:[%s2992_s7] ss:$0 sm:$0xff] }
 0xc17   : > { %v1488_v36 = vpack.c.bf16 %v1486_v34, %v1486_v34 }
 0xc1a   : > { %v2328_v26 = vpop.permute.xlu0 %2327 }
 0xc1b   : > { %v2330_v29 = vunpack.i.h.bf16 %v2328_v26  ;;  %v2329_v30 = vunpack.i.l.bf16 %v2328_v26 }
 0xc1d   : > { %v1484_v35 = vsel %vm828_vm8, %v1481_v31, %v2329_v30  ;;  %v1485_v21 = vsel %vm828_vm8, %v1482_v33, %v2330_v29 }
 0xc1e   : > { %v1487_v17 = vpack.c.bf16 %v1485_v21, %v1484_v35 }
 0xc20   : > { %2243 = vmatprep.mubr.msk.bf16.mxu0 %vm1512_vm11, %v1487_v17  ;;  %v2373_v17 = vld [vmem:[%s2995_s10] sm:$0xff]  }
 0xc21   : > { %2244 = vmatmul.mubr.msk.bf16.vlgmr.msra.gmra.mrb[24].mxu0 %vm1512_vm11, %v1488_v36  ;;  %2267 = vmatprep.subr.bf16.mxu0 %v2373_v17  ;;  %v2374_v36 = vld [vmem:[%s2995_s10 + $0x8] sm:$0xff]  }
 0xc22   : > { %2268 = vmatpush3.bf16.msra.mxu0 %v2373_v17 }
 0xc23   : > { %2269 = vmatprep.subr.bf16.mxu0 %v2374_v36 }
 0xc26   : > { %2270 = vmatpush3.bf16.msra.mxu0 %v2374_v36 }
 0xcf4   : > { %v2245_v7 = vpop.f32.mrb[24].mxu0 }
 0xcf5   : > { %v1553_v38 = vpop.f32.mrb[25].mxu0  ;;  %v1562_v42 = vadd.f32 %v2245_v7, %v2062_v15  ;;  %v2376_v7 = vld [vmem:[%s2995_s10 + $0x18] sm:$0xff]  }
 0xcf6   : > { %v1554_v39 = vadd.f32 %v2062_v15, %v1553_v38  ;;  %v2246_v40 = vpop.f32.mrb[26].mxu0  ;;  %v2377_v38 = vld [vmem:[%s2995_s10 + $0x20] sm:$0xff]  }
 0xcf7   : > { %v1556_v41 = vpop.f32.mrb[27].mxu0  ;;  %v2862_v37 = vadd.f32 %v2455_v47, %v1562_v42  ;;  %v2379_v40 = vld [vmem:[%s2995_s10 + $0x30] sm:$0xff]   ;;  %v2069_v42 = vld [vmem:[%s2994_s9] ss:$0 sm:$0xff] }
 0xcf8   : > { %v2855_v43 = vadd.f32 %v2453_v32, %v1554_v39  ;;  %v1557_v44 = vadd.f32 %v2062_v15, %v1556_v41  ;;  %v2375_v15 = vld [vmem:[%s2995_s10 + $0x10] sm:$0xff]   ;;  %v2378_v39 = vld [vmem:[%s2995_s10 + $0x28] sm:$0xff]   ;;  %v2380_v41 = vld [vmem:[%s2995_s10 + $0x38] sm:$0xff]  }
 0xcf9   : > { %2271 = vmatprep.subr.bf16.mxu0 %v2375_v15 }
 0xcfa   : > { %v2858_v46 = vadd.f32 %v2454_v45, %v1557_v44  ;;  %1572 = vadd.xlane.f32.xlu0 %v2855_v43  ;;  %2272 = vmatpush3.bf16.msra.mxu0 %v2375_v15 }
 0xcfb   : > { %2273 = vmatprep.subr.bf16.mxu0 %v2376_v7 }
 0xcfc   : > { %1574 = vadd.xlane.f32.xlu1 %v2858_v46 }
 0xcfe   : > { %1576 = vadd.xlane.f32.xlu0 %v2862_v37  ;;  %2274 = vmatpush3.bf16.msra.mxu0 %v2376_v7 }
 0xcff   : > { %2275 = vmatprep.subr.bf16.mxu0 %v2377_v38 }
 0xd02   : > { %2276 = vmatpush3.bf16.msra.mxu0 %v2377_v38 }
 0xd03   : > { %2277 = vmatprep.subr.bf16.mxu0 %v2378_v39 }
 0xd06   : > { %2278 = vmatpush3.bf16.msra.mxu0 %v2378_v39 }
 0xd07   : > { %2279 = vmatprep.subr.bf16.mxu0 %v2379_v40 }
 0xd0a   : > { %2280 = vmatpush3.bf16.msra.mxu0 %v2379_v40 }
 0xd0b   : > { %2281 = vmatprep.subr.bf16.mxu0 %v2380_v41 }
 0xd0e   : > { %2282 = vmatpush3.bf16.msra.mxu0 %v2380_v41 }
 0xd87   : > { %v1573_v49 = vpop.xlane.xlu0 %1572 }
 0xd88   : > { %v1578_v50 = vmul.f32 0.03125, %v1573_v49 }
 0xd89   : > { %v1575_v51 = vpop.xlane.xlu1 %1574 }
 0xd8a   : > { %v1581_v52 = vsub.f32 %v2855_v43, %v1578_v50  ;;  %v1579_v53 = vmul.f32 0.03125, %v1575_v51 }
 0xd8b   : > { %v1577_v54 = vpop.xlane.xlu0 %1576 }
 0xd8c   : > { %v1582_v55 = vsub.f32 %v2858_v46, %v1579_v53  ;;  %v1580_v20 = vmul.f32 0.03125, %v1577_v54  ;;  %v1584_v56 = vsel %vm417_vm0, %v1581_v52, 0.0 }
 0xd8d   : > { %v1587_v12 = vmul.f32 %v1584_v56, %v1584_v56 }
 0xd8e   : > { %v1583_v18 = vsub.f32 %v2862_v37, %v1580_v20  ;;  %v1585_v11 = vsel %vm417_vm0, %v1582_v55, 0.0 }
 0xd8f   : > { %1590 = vadd.xlane.f32.xlu0 %v1587_v12  ;;  %v1588_v22 = vmul.f32 %v1585_v11, %v1585_v11 }
 0xd90   : > { %v1586_v19 = vsel %vm417_vm0, %v1583_v18, 0.0 }
 0xd91   : > { %v1589_v57 = vmul.f32 %v1586_v19, %v1586_v19 }
 0xd93   : > { %1592 = vadd.xlane.f32.xlu0 %v1588_v22  ;;  %1594 = vadd.xlane.f32.xlu1 %v1589_v57 }
 0xe1c   : > { %v1591_v60 = vpop.xlane.xlu0 %1590 }
 0xe1d   : > { %v1596_v61 = vmul.f32 0.03125, %v1591_v60 }
 0xe1f   : > { %v1599_v62 = vadd.f32 1e-05, %v1596_v61 }
 0xe20   : > { %v1595_v63 = vpop.xlane.xlu1 %1594  ;;  %v1593_v0 = vpop.xlane.xlu0 %1592 }
 0xe21   : > { %2435 = vrsqrt.f32 %v1599_v62  ;;  %v1598_v1 = vmul.f32 0.03125, %v1595_v63  ;;  %v1597_v2 = vmul.f32 0.03125, %v1593_v0 }
 0xe23   : > { %v1601_v3 = vadd.f32 1e-05, %v1598_v1  ;;  %v1600_v4 = vadd.f32 1e-05, %v1597_v2 }
 0xe25   : > { %2437 = vrsqrt.f32 %v1601_v3 }
 0xe26   : > { %2439 = vrsqrt.f32 %v1600_v4 }
 0xe2b   : > { %v2436_v5 = vpop.eup %2435 }
 0xe2c   : > { %v1605_v6 = vmul.f32 %v2436_v5, %v1584_v56 }
 0xe2e   : > { %v1614_v26 = vmul.f32 %v2067_v9, %v1605_v6 }
 0xe2f   : > { %v2438_v10 = vpop.eup %2437 }
 0xe30   : > { %v2440_v14 = vpop.eup %2439  ;;  %v1607_v24 = vmul.f32 %v2438_v10, %v1586_v19  ;;  %v1623_v33 = vadd.f32 %v2068_v27, %v1614_v26 }
 0xe31   : > { %v1606_v25 = vmul.f32 %v2440_v14, %v1585_v11 }
 0xe32   : > { %v1616_v29 = vmul.f32 %v2067_v9, %v1607_v24 }
 0xe33   : > { %v1615_v30 = vmul.f32 %v2067_v9, %v1606_v25 }
 0xe34   : > { %v1625_v31 = vadd.f32 %v2068_v27, %v1616_v29 }
 0xe35   : > { %v1624_v34 = vadd.f32 %v2068_v27, %v1615_v30 }
 0xe36   : > { %v1627_v35 = vpack.c.bf16 %v1625_v31, %v1625_v31 }
 0xe37   : > { %v1626_v21 = vpack.c.bf16 %v1624_v34, %v1623_v33 }
 0xe39   : > { %2263 = vmatprep.mubr.bf16.mxu1 %v1626_v21 }
 0xe3a   : > { %2264 = vmatmul.mubr.bf16.vlgmr.msra.gmra.mrb[20].mxu1 %v1627_v35 }
 0xf0d   : > { %v2265_v32 = vpop.f32.mrb[20].mxu1 }
 0xf0e   : > { %v2932_v44 = vadd.f32 %v2265_v32, %v2069_v42  ;;  %v1733_v45 = vpop.f32.mrb[21].mxu1 }
 0xf0f   : > { %v2934_v47 = vadd.f32 %v2069_v42, %v1733_v45  ;;  %v2266_v48 = vpop.f32.mrb[22].mxu1 }
 0xf10   : > { %v2937_v49 = vmul.f32 0.70710677, %v2932_v44  ;;  %v1736_v50 = vpop.f32.mrb[23].mxu1 }
 0xf11   : > { %v2940_v51 = vmul.f32 0.70710677, %v2934_v47  ;;  %v2942_v52 = vadd.f32 %v2069_v42, %v1736_v50 }
 0xf12   : > { %vm1755_vm12 = vcmp.ge.f32.partialorder %v2937_v49, 0.0  ;;  %v1761_v53 = vsub.f32 0.0, %v2937_v49 }
 0xf13   : > { %vm1753_vm13 = vcmp.ge.f32.partialorder %v2940_v51, 0.0  ;;  %v1759_v54 = vsub.f32 0.0, %v2940_v51  ;;  %v2952_v20 = vmul.f32 0.70710677, %v2942_v52 }
 0xf14   : > { %v1764_v55 = vsel %vm1755_vm12, %v2937_v49, %v1761_v53  ;;  %v1747_v49 = vmul.f32 0.5, %v2934_v47 }
 0xf15   : > { %v1767_v56 = vmul.f32 0.3275911, %v1764_v55  ;;  %v1762_v12 = vsel %vm1753_vm13, %v2940_v51, %v1759_v54  ;;  %vm1754_vm14 = vcmp.ge.f32.partialorder %v2952_v20, 0.0  ;;  %v1760_v11 = vsub.f32 0.0, %v2952_v20 }
 0xf16   : > { %v1765_v18 = vmul.f32 0.3275911, %v1762_v12  ;;  %v1806_v8 = vsub.f32 0.0, %v1764_v55  ;;  %v1804_v23 = vsub.f32 0.0, %v1762_v12 }
 0xf17   : > { %v1770_v19 = vadd.f32 1.0, %v1767_v56  ;;  %v1763_v57 = vsel %vm1754_vm14, %v2952_v20, %v1760_v11  ;;  %v2078_v20 = vld [vmem:[%s2996_s11] ss:$0 sm:$0xff] }
 0xf18   : > { %v1768_v22 = vadd.f32 1.0, %v1765_v18  ;;  %v1766_v16 = vmul.f32 0.3275911, %v1763_v57  ;;  %v1809_v13 = vmul.f32 %v1806_v8, %v1764_v55  ;;  %v1805_v28 = vsub.f32 0.0, %v1763_v57 }
 0xf19   : > { %2441 = vrcp.f32 %v1770_v19  ;;  %v1807_v62 = vmul.f32 %v1804_v23, %v1762_v12  ;;  %v2471_v55 = vmov -1.0  }
 0xf1a   : > { %2443 = vrcp.f32 %v1768_v22  ;;  %v1769_v58 = vadd.f32 1.0, %v1766_v16  ;;  %v1814_v2 = vmul.f32 1.442695, %v1809_v13  ;;  %v1808_v4 = vmul.f32 %v1805_v28, %v1763_v57 }
 0xf1b   : > { %v1810_v6 = vmul.f32 1.442695, %v1807_v62  ;;  %v1758_v56 = vsel %vm1755_vm12, 1.0, %v2471_v55  ;;  %v1756_v11 = vsel %vm1753_vm13, 1.0, %v2471_v55  ;;  %v1748_v13 = vmul.f32 0.5, %v2942_v52 }
 0xf1c   : > { %2445 = vrcp.f32 %v1769_v58  ;;  %v1812_v26 = vmul.f32 1.442695, %v1808_v4  ;;  %v1757_v58 = vsel %vm1754_vm14, 1.0, %v2471_v55 }
 0xf1d   : > { %2447 = vpow2.f32 %v1814_v2 }
 0xf1e   : > { %2449 = vpow2.f32 %v1810_v6 }
 0xf1f   : > { %2451 = vpow2.f32 %v1812_v26 }
 0xf23   : > { %v2442_v59 = vpop.eup %2441 }
 0xf24   : > { %v2444_v60 = vpop.eup %2443  ;;  %v1779_v61 = vmul.f32 1.0614054, %v2442_v59 }
 0xf25   : > { %v1777_v63 = vmul.f32 1.0614054, %v2444_v60 }
 0xf26   : > { %v1782_v0 = vadd.f32 -1.4531521, %v1779_v61  ;;  %v2446_v1 = vpop.eup %2445 }
 0xf27   : > { %v1780_v3 = vadd.f32 -1.4531521, %v1777_v63  ;;  %v1778_v9 = vmul.f32 1.0614054, %v2446_v1  ;;  %v2448_v40 = vpop.eup %2447 }
 0xf28   : > { %v1785_v5 = vmul.f32 %v2442_v59, %v1782_v0  ;;  %v2450_v42 = vpop.eup %2449 }
 0xf29   : > { %v1783_v10 = vmul.f32 %v2444_v60, %v1780_v3  ;;  %v1781_v24 = vadd.f32 -1.4531521, %v1778_v9  ;;  %v2452_v54 = vpop.eup %2451 }
 0xf2a   : > { %v1788_v14 = vadd.f32 1.4214138, %v1785_v5 }
 0xf2b   : > { %v1786_v25 = vadd.f32 1.4214138, %v1783_v10  ;;  %v1784_v29 = vmul.f32 %v2446_v1, %v1781_v24 }
 0xf2c   : > { %v1791_v27 = vmul.f32 %v2442_v59, %v1788_v14 }
 0xf2d   : > { %v1789_v30 = vmul.f32 %v2444_v60, %v1786_v25  ;;  %v1787_v33 = vadd.f32 1.4214138, %v1784_v29 }
 0xf2e   : > { %v1794_v31 = vadd.f32 -0.28449672, %v1791_v27 }
 0xf2f   : > { %v1792_v34 = vadd.f32 -0.28449672, %v1789_v30  ;;  %v1790_v21 = vmul.f32 %v2446_v1, %v1787_v33 }
 0xf30   : > { %v1797_v35 = vmul.f32 %v2442_v59, %v1794_v31 }
 0xf31   : > { %v1795_v17 = vmul.f32 %v2444_v60, %v1792_v34  ;;  %v1793_v15 = vadd.f32 -0.28449672, %v1790_v21 }
 0xf32   : > { %v1800_v36 = vadd.f32 0.2548296, %v1797_v35 }
 0xf33   : > { %v1798_v7 = vadd.f32 0.2548296, %v1795_v17  ;;  %v1796_v39 = vmul.f32 %v2446_v1, %v1793_v15 }
 0xf34   : > { %v1803_v38 = vmul.f32 %v2442_v59, %v1800_v36  ;;  %v1749_v59 = vmul.f32 0.5, %v2932_v44 }
 0xf35   : > { %v1801_v41 = vmul.f32 %v2444_v60, %v1798_v7  ;;  %v1799_v45 = vadd.f32 0.2548296, %v1796_v39 }
 0xf36   : > { %v1818_v32 = vmul.f32 %v2448_v40, %v1803_v38 }
 0xf37   : > { %v1816_v48 = vmul.f32 %v2450_v42, %v1801_v41  ;;  %v1802_v53 = vmul.f32 %v2446_v1, %v1799_v45 }
 0xf38   : > { %v1821_v50 = vsub.f32 1.0, %v1818_v32 }
 0xf39   : > { %v1819_v12 = vsub.f32 1.0, %v1816_v48  ;;  %v1817_v19 = vmul.f32 %v2452_v54, %v1802_v53 }
 0xf3a   : > { %v1824_v18 = vmul.f32 %v1821_v50, %v1758_v56 }
 0xf3b   : > { %v1822_v22 = vmul.f32 %v1819_v12, %v1756_v11  ;;  %v1820_v57 = vsub.f32 1.0, %v1817_v19 }
 0xf3c   : > { %v1827_v16 = vadd.f32 1.0, %v1824_v18 }
 0xf3d   : > { %v1825_v8 = vadd.f32 1.0, %v1822_v22  ;;  %v1823_v23 = vmul.f32 %v1820_v57, %v1757_v58 }
 0xf3e   : > { %v1830_v60 = vmul.f32 %v1827_v16, %v1749_v59 }
 0xf3f   : > { %v1826_v28 = vadd.f32 1.0, %v1823_v23  ;;  %v1828_v51 = vmul.f32 %v1825_v8, %v1747_v49 }
 0xf40   : > { %v1832_v63 = vpack.c.bf16 %v1830_v60, %v1830_v60 }
 0xf41   : > { %v1829_v61 = vmul.f32 %v1826_v28, %v1748_v13 }
 0xf43   : > { %v1831_v62 = vpack.c.bf16 %v1829_v61, %v1828_v51 }
 0xf45   : > { %2283 = vmatprep.mubr.bf16.mxu0 %v1831_v62 }
 0xf46   : > { %2284 = vmatmul.mubr.bf16.vlgmr.msra.gmra.mrb[28].mxu0 %v1832_v63 }
0x1019   : > { %v2285_v0 = vpop.f32.mrb[28].mxu0 }
0x101a   : > { %v1947_v1 = vadd.f32 %v2285_v0, %v2078_v20  ;;  %v1938_v2 = vpop.f32.mrb[29].mxu0 }
0x101b   : > { %v1939_v44 = vadd.f32 %v2078_v20, %v1938_v2  ;;  %v2286_v47 = vpop.f32.mrb[30].mxu0 }
0x101c   : > { %v1954_v52 = vadd.f32 %v1947_v1, %v2862_v37  ;;  %v1941_v3 = vpop.f32.mrb[31].mxu0 }
0x101d   : > { %v1952_v4 = vadd.f32 %v1939_v44, %v2855_v43  ;;  %v1942_v5 = vadd.f32 %v2078_v20, %v1941_v3 }
0x101e   : > { %1957 = vst [vmem:[%s413_s14 + $0x10] sm:$0xff] %v1954_v52 }
0x101f   : > { %1955 = vst [vmem:[%s413_s14] sm:$0xff] %v1952_v4  ;;  %v1953_v6 = vadd.f32 %v1942_v5, %v2858_v46 }
0x1021   : > { %1956 = vst [vmem:[%s413_s14 + $0x8] sm:$0xff] %v1953_v6 }
0x1022 PF: > { %s22_s21 = sadd.s32 1, %s2462_s21  }
0x1023   : > { %p19_p4 = scmp.ge.s32.totalorder %s22_s21, 4  }
0x1025   :  { %21 = sbr.rel (!%p19_p4) target bundleno = 1 (0x1), region = 98 }

</bundles_post_ra>
